<compile_context>
chip_gen: v7x
topology: tpu7x:2x2x1
jax: 0.10.0
libtpu: 0.0.40
codegen_flags: <defaults>
</compile_context>

<pallas_src>
import jax
import jax.numpy as jnp
from jax.experimental import pallas as pl
from jax.experimental.pallas import tpu as pltpu

# ---------------- hyper-parameters consistent with the module ----------------
LAYERS = 3
BLOCKS = 2
DILATION_CHANNELS = 8
RESIDUAL_CHANNELS = 8
SKIP_CHANNELS = 16
INPUT_CHANNEL = 4
INITIAL_KERNEL = 2
KERNEL_SIZE = 2
OUTPUT_CHANNEL = 4
BATCH = 2
SEQ_LEN = 32


def build_dilations(layers, blocks):
    """Mirror WaveNetModel.__init__ dilation schedule (last block has layers-1)."""
    dil = []
    for b in range(blocks):
        actual = layers if b != blocks - 1 else layers - 1
        d = 1
        for _ in range(actual):
            dil.append(d)
            d *= 2
    return dil


DILATIONS = build_dilations(LAYERS, BLOCKS)          # [1, 2, 4, 1, 2]
NUM_LAYERS = len(DILATIONS)
RECEPTIVE_FIELD = (INITIAL_KERNEL - 1) + sum(d * (KERNEL_SIZE - 1) for d in DILATIONS) + 1


def _out_len(seq_len):
    return seq_len - (RECEPTIVE_FIELD - 1)


# ------------------------------ fused Pallas kernel ---------------------------
_DN = (((2,), (1,)), ((0,), (0,)))   # (B, M, K) x (B, K, N) -> (B, M, N)


def _bmm(w, x):
    """Canonical batched matmul on the MXU (weights pre-broadcast over B)."""
    return jax.lax.dot_general(w, x, dimension_numbers=_DN,
                               preferred_element_type=jnp.float32)


def _fused_wavenet_kernel(x_ref, w0_ref, b0_ref, wd_ref, bd_ref,
                          wsr_ref, bsr_ref, we_ref, be_ref, out_ref):
    """Whole WaveNet forward, batched, NCT layout, resident in VMEM.

    x_ref  : (B, Cin, T)                     -- native PyTorch layout, no transpose
    w0_ref : (B, K0*Cres, Cin)               b0_ref : (Cres, 1)
    wd_ref : (NL, B, K*2*Cdil, Cres)         bd_ref : (NL, 2*Cdil, 1)
    wsr_ref: (NL, B, Cskip+Cres, Cdil)       bsr_ref: (NL, Cskip+Cres, 1)
    we_ref : (B, Cout, Cskip)                be_ref : (Cout, 1)
    out_ref: (B, Cout, Lout)
    """
    x = x_ref[...].astype(jnp.float32)       # (B, Cin, T)
    B = x.shape[0]
    T = x.shape[2]
    Cres = RESIDUAL_CHANNELS
    Cdil = DILATION_CHANNELS

    # ---- start conv: ONE matmul; taps stacked on the output-channel axis ----
    L = T - (INITIAL_KERNEL - 1)
    hh = _bmm(w0_ref[...], x)                                    # (B, K0*Cres, T)
    h = hh[:, :Cres, :L] + hh[:, Cres:, 1:1 + L] + b0_ref[...]   # (B, Cres, L)

    # skip accumulator starts at 0 (matches `skip = 0` in the torch forward)
    skip = jnp.zeros((B, SKIP_CHANNELS, L), jnp.float32)

    # ---- gated residual layers ----
    for i, d in enumerate(DILATIONS):
        Lo = L - d * (KERNEL_SIZE - 1)
        off = L - Lo

        # merged filter|gate dilated conv, both taps via ONE matmul on full h;
        # tap recombination uses sublane-aligned (0 / 16) channel slices only.
        zz = _bmm(wd_ref[i], h)                                  # (B, 2*K*Cdil, L)
        z = zz[:, :2 * Cdil, :Lo] + zz[:, 2 * Cdil:, d:d + Lo] + bd_ref[i]
        gated = jnp.tanh(z[:, :Cdil, :]) * jax.nn.sigmoid(z[:, Cdil:, :])

        # fused skip|residual 1x1 convs: one matmul, tile-aligned split at 16
        sr = _bmm(wsr_ref[i], gated) + bsr_ref[i]                # (B, Cskip+Cres, Lo)
        skip = sr[:, :SKIP_CHANNELS, :] + skip[:, :, off:]
        h = sr[:, SKIP_CHANNELS:, :] + h[:, :, off:]
        L = Lo

    # ---- end conv: relu(skip) -> 1x1 conv; single dense NCT store ----
    out = _bmm(we_ref[...], jnp.maximum(skip, 0.0)) + be_ref[...]  # (B, Cout, Lout)
    out_ref[...] = out.astype(out_ref.dtype)


# ----------------------------- parameter setup --------------------------------
def init_params(key):
    """Deterministic init in PyTorch Conv1d layout: W (Cout, Cin, K), b (Cout,)."""
    keys = iter(jax.random.split(key, 64))

    def conv_w(cout, cin, k):
        return 0.2 * jax.random.normal(next(keys), (cout, cin, k), jnp.float32)

    def conv_b(cout):
        return 0.1 * jax.random.normal(next(keys), (cout,), jnp.float32)

    params = {
        "start_w": conv_w(RESIDUAL_CHANNELS, INPUT_CHANNEL, INITIAL_KERNEL),
        "start_b": conv_b(RESIDUAL_CHANNELS),
        "end_w": conv_w(OUTPUT_CHANNEL, SKIP_CHANNELS, 1),
        "end_b": conv_b(OUTPUT_CHANNEL),
        "layers": [],
    }
    for _ in DILATIONS:
        params["layers"].append({
            "w_dil": conv_w(2 * DILATION_CHANNELS, RESIDUAL_CHANNELS, KERNEL_SIZE),
            "b_dil": conv_b(2 * DILATION_CHANNELS),
            "w_skip": conv_w(SKIP_CHANNELS, DILATION_CHANNELS, 1),
            "b_skip": conv_b(SKIP_CHANNELS),
            "w_res": conv_w(RESIDUAL_CHANNELS, DILATION_CHANNELS, 1),
            "b_res": conv_b(RESIDUAL_CHANNELS),
        })
    return params


def convert_params(params, batch=BATCH):
    """One-time conversion from PyTorch Conv1d layout to kernel layout.

    All transposes / tap-stacking / batch-broadcasts are hoisted here so the
    forward kernel issues no re-layout ops.
    """
    def bcast(w):                                   # pre-broadcast weight over batch
        return jnp.broadcast_to(w[None], (batch,) + w.shape)

    def stack_taps(w):                              # (O, C, K) -> (K*O, C)
        o, c, k = w.shape
        return jnp.transpose(w, (2, 0, 1)).reshape(k * o, c)

    wd, bd, wsr, bsr = [], [], [], []
    for lp in params["layers"]:
        wd.append(bcast(stack_taps(lp["w_dil"])))                       # (B, K*2Cdil, Cres)
        bd.append(lp["b_dil"][:, None])                                 # (2Cdil, 1)
        wsr.append(bcast(jnp.concatenate([lp["w_skip"][:, :, 0],
                                          lp["w_res"][:, :, 0]], axis=0)))  # (B, Cskip+Cres, Cdil)
        bsr.append(jnp.concatenate([lp["b_skip"], lp["b_res"]])[:, None])   # (Cskip+Cres, 1)
    return {
        "w0": bcast(stack_taps(params["start_w"])),                     # (B, K0*Cres, Cin)
        "b0": params["start_b"][:, None],                               # (Cres, 1)
        "wd": jnp.stack(wd),                                            # (NL, B, K*2Cdil, Cres)
        "bd": jnp.stack(bd),                                            # (NL, 2Cdil, 1)
        "wsr": jnp.stack(wsr),                                          # (NL, B, Cskip+Cres, Cdil)
        "bsr": jnp.stack(bsr),                                          # (NL, Cskip+Cres, 1)
        "we": bcast(params["end_w"][:, :, 0]),                          # (B, Cout, Cskip)
        "be": params["end_b"][:, None],                                 # (Cout, 1)
    }


# ----------------------------- Pallas forward ---------------------------------
def _tensorcores_per_chip():
    """v7x has 2 TensorCores per chip; v5e/v6e have 1 (default safely to 1)."""
    try:
        kind = jax.devices()[0].device_kind.lower()
    except Exception:
        return 1
    return 2 if ("v7" in kind or "7x" in kind) else 1


@jax.jit
def wavenet_forward_pallas(x_nct, cp):
    """x_nct: (B, input_channel, T)  ->  (B, output_channel, T_out).  NCT in, NCT out."""
    x = x_nct.astype(jnp.float32)
    B, Cin, T = x.shape
    Lout = _out_len(T)
    if Lout <= 0:
        raise ValueError(f"sequence length {T} is shorter than the receptive "
                         f"field {RECEPTIVE_FIELD}; output would be empty")

    out_shape = jax.ShapeDtypeStruct((B, OUTPUT_CHANNEL, Lout), jnp.float32)
    args = (x, cp["w0"], cp["b0"], cp["wd"], cp["bd"],
            cp["wsr"], cp["bsr"], cp["we"], cp["be"])

    if _tensorcores_per_chip() > 1 and B > 1:
        # v7x: one batch element per program, sharded across the 2 TensorCores.
        nl = cp["wd"].shape[0]
        in_specs = [
            pl.BlockSpec((1, Cin, T), lambda b: (b, 0, 0)),                       # x
            pl.BlockSpec((1,) + cp["w0"].shape[1:], lambda b: (b, 0, 0)),         # w0
            pl.BlockSpec(cp["b0"].shape, lambda b: (0, 0)),                       # b0
            pl.BlockSpec((nl, 1) + cp["wd"].shape[2:], lambda b: (0, b, 0, 0)),   # wd
            pl.BlockSpec(cp["bd"].shape, lambda b: (0, 0, 0)),                    # bd
            pl.BlockSpec((nl, 1) + cp["wsr"].shape[2:], lambda b: (0, b, 0, 0)),  # wsr
            pl.BlockSpec(cp["bsr"].shape, lambda b: (0, 0, 0)),                   # bsr
            pl.BlockSpec((1,) + cp["we"].shape[1:], lambda b: (b, 0, 0)),         # we
            pl.BlockSpec(cp["be"].shape, lambda b: (0, 0)),                       # be
        ]
        out_specs = pl.BlockSpec((1, OUTPUT_CHANNEL, Lout), lambda b: (b, 0, 0))
        return pl.pallas_call(
            _fused_wavenet_kernel, out_shape=out_shape,
            grid=(B,), in_specs=in_specs, out_specs=out_specs,
            compiler_params=pltpu.CompilerParams(dimension_semantics=("parallel",)),
        )(*args)

    # v5e / v6e (single TensorCore): grid-less fully fused call; the whole
    # network (a few hundred KB of f32) lives in VMEM with zero grid-step overhead.
    return pl.pallas_call(_fused_wavenet_kernel, out_shape=out_shape)(*args)


# ----------------------------- pure-JAX reference ------------------------------
def _conv1d_ref(x_nct, w_oik, b, dilation=1):
    out = jax.lax.conv_general_dilated(
        x_nct, w_oik, window_strides=(1,), padding="VALID",
        rhs_dilation=(dilation,), dimension_numbers=("NCH", "OIH", "NCH"))
    return out + b[None, :, None]


def wavenet_forward_reference(x, params):
    x = _conv1d_ref(x, params["start_w"], params["start_b"])
    skip = None
    for i, d in enumerate(DILATIONS):
        lp = params["layers"][i]
        residual = x
        dil = _conv1d_ref(x, lp["w_dil"], lp["b_dil"], d)
        f = jnp.tanh(dil[:, :DILATION_CHANNELS])
        g = jax.nn.sigmoid(dil[:, DILATION_CHANNELS:])
        x = f * g
        s = _conv1d_ref(x, lp["w_skip"], lp["b_skip"])
        skip = s if skip is None else s + skip[:, :, -s.shape[2]:]
        x = _conv1d_ref(x, lp["w_res"], lp["b_res"])
        x = x + residual[:, :, -x.shape[2]:]
    x = jax.nn.relu(skip)
    return _conv1d_ref(x, params["end_w"], params["end_b"])


# TODO(synk): get_phonetic() is a host-side numpy sliding-window + argmax loop,
# not part of the nn.Module forward hot path; it is intentionally not kernelized.

if __name__ == "__main__":
    key = jax.random.PRNGKey(0)
    pkey, xkey = jax.random.split(key)
    params = init_params(pkey)
    cparams = convert_params(params, BATCH)   # one-time layout conversion (hoisted)
    x = jax.random.normal(xkey, (BATCH, INPUT_CHANNEL, SEQ_LEN), jnp.float32)

    out = jax.block_until_ready(wavenet_forward_pallas(x, cparams))
    ref = jax.block_until_ready(wavenet_forward_reference(x, params))

    assert out.shape == ref.shape, (out.shape, ref.shape)
    max_err = float(jnp.max(jnp.abs(out - ref)))
    if max_err > 1e-4:
        raise AssertionError(f"Pallas/ref mismatch, max abs err = {max_err}")
    print("KERNEL_OK")
</pallas_src>

<mosaic_0001>
module attributes {stable_mosaic.version = 11 : i64} {
  func.func @_fused_wavenet_kernel(%arg0: memref<2x4x32xf32, #tpu.memory_space<vmem>>, %arg1: memref<2x16x4xf32, #tpu.memory_space<vmem>>, %arg2: memref<8x1xf32, #tpu.memory_space<vmem>>, %arg3: memref<5x2x32x8xf32, #tpu.memory_space<vmem>>, %arg4: memref<5x16x1xf32, #tpu.memory_space<vmem>>, %arg5: memref<5x2x24x8xf32, #tpu.memory_space<vmem>>, %arg6: memref<5x24x1xf32, #tpu.memory_space<vmem>>, %arg7: memref<2x4x16xf32, #tpu.memory_space<vmem>>, %arg8: memref<4x1xf32, #tpu.memory_space<vmem>>, %arg9: memref<2x4x21xf32, #tpu.memory_space<vmem>>) attributes {dimension_semantics = [], scalar_prefetch = 0 : i64, scratch_operands = 0 : i64, tpu.core_type = #tpu.core_type<tc>} {
    %c0 = arith.constant 0 : index
    %c0_0 = arith.constant 0 : index
    %c0_1 = arith.constant 0 : index
    %0 = vector.load %arg0[%c0, %c0_0, %c0_1] : memref<2x4x32xf32, #tpu.memory_space<vmem>>, vector<2x4x32xf32>
    %c0_2 = arith.constant 0 : index
    %c0_3 = arith.constant 0 : index
    %c0_4 = arith.constant 0 : index
    %1 = vector.load %arg1[%c0_2, %c0_3, %c0_4] : memref<2x16x4xf32, #tpu.memory_space<vmem>>, vector<2x16x4xf32>
    %cst = arith.constant dense<0.000000e+00> : vector<2x16x32xf32>
    %2 = tpu.matmul %1, %0, %cst {dimension_numbers = #tpu.dot_dimension_numbers<[2], [1], [1], [2], [0, 0, 0, 1, 1, 2], [0], [0]>} : vector<2x16x4xf32>, vector<2x4x32xf32>, vector<2x16x32xf32> -> vector<2x16x32xf32>
    %3 = vector.extract_strided_slice %2 {offsets = [0, 0, 0], sizes = [2, 8, 31], strides = [1, 1, 1]} : vector<2x16x32xf32> to vector<2x8x31xf32>
    %4 = vector.extract_strided_slice %2 {offsets = [0, 8, 1], sizes = [2, 8, 31], strides = [1, 1, 1]} : vector<2x16x32xf32> to vector<2x8x31xf32>
    %5 = arith.addf %3, %4 : vector<2x8x31xf32>
    %c0_5 = arith.constant 0 : index
    %c0_6 = arith.constant 0 : index
    %6 = vector.load %arg2[%c0_5, %c0_6] : memref<8x1xf32, #tpu.memory_space<vmem>>, vector<8x1xf32>
    %7 = vector.shape_cast %6 : vector<8x1xf32> to vector<1x8x1xf32>
    %8 = vector.broadcast %7 : vector<1x8x1xf32> to vector<2x8x31xf32>
    %9 = arith.addf %5, %8 : vector<2x8x31xf32>
    %cst_7 = arith.constant 0.000000e+00 : f32
    %10 = vector.broadcast %cst_7 : f32 to vector<2x16x31xf32>
    %c0_8 = arith.constant 0 : index
    %c0_9 = arith.constant 0 : index
    %c0_10 = arith.constant 0 : index
    %c0_11 = arith.constant 0 : index
    %11 = vector.load %arg3[%c0_8, %c0_9, %c0_10, %c0_11] : memref<5x2x32x8xf32, #tpu.memory_space<vmem>>, vector<1x2x32x8xf32>
    %12 = vector.shape_cast %11 : vector<1x2x32x8xf32> to vector<2x32x8xf32>
    %cst_12 = arith.constant dense<0.000000e+00> : vector<2x32x31xf32>
    %13 = tpu.matmul %12, %9, %cst_12 {dimension_numbers = #tpu.dot_dimension_numbers<[2], [1], [1], [2], [0, 0, 0, 1, 1, 2], [0], [0]>} : vector<2x32x8xf32>, vector<2x8x31xf32>, vector<2x32x31xf32> -> vector<2x32x31xf32>
    %14 = vector.extract_strided_slice %13 {offsets = [0, 0, 0], sizes = [2, 16, 30], strides = [1, 1, 1]} : vector<2x32x31xf32> to vector<2x16x30xf32>
    %15 = vector.extract_strided_slice %13 {offsets = [0, 16, 1], sizes = [2, 16, 30], strides = [1, 1, 1]} : vector<2x32x31xf32> to vector<2x16x30xf32>
    %16 = arith.addf %14, %15 : vector<2x16x30xf32>
    %c0_13 = arith.constant 0 : index
    %c0_14 = arith.constant 0 : index
    %c0_15 = arith.constant 0 : index
    %17 = vector.load %arg4[%c0_13, %c0_14, %c0_15] : memref<5x16x1xf32, #tpu.memory_space<vmem>>, vector<1x16x1xf32>
    %18 = vector.shape_cast %17 : vector<1x16x1xf32> to vector<16x1xf32>
    %19 = vector.shape_cast %18 : vector<16x1xf32> to vector<1x16x1xf32>
    %20 = vector.broadcast %19 : vector<1x16x1xf32> to vector<2x16x30xf32>
    %21 = arith.addf %16, %20 : vector<2x16x30xf32>
    %22 = vector.extract_strided_slice %21 {offsets = [0, 0, 0], sizes = [2, 8, 30], strides = [1, 1, 1]} : vector<2x16x30xf32> to vector<2x8x30xf32>
    %23 = math.tanh %22 : vector<2x8x30xf32>
    %24 = vector.extract_strided_slice %21 {offsets = [0, 8, 0], sizes = [2, 8, 30], strides = [1, 1, 1]} : vector<2x16x30xf32> to vector<2x8x30xf32>
    %25 = arith.negf %24 : vector<2x8x30xf32>
    %26 = math.exp %25 : vector<2x8x30xf32>
    %cst_16 = arith.constant 1.000000e+00 : f32
    %27 = vector.broadcast %cst_16 : f32 to vector<2x8x30xf32>
    %28 = arith.addf %27, %26 : vector<2x8x30xf32>
    %29 = arith.divf %27, %28 : vector<2x8x30xf32>
    %30 = arith.mulf %23, %29 : vector<2x8x30xf32>
    %c0_17 = arith.constant 0 : index
    %c0_18 = arith.constant 0 : index
    %c0_19 = arith.constant 0 : index
    %c0_20 = arith.constant 0 : index
    %31 = vector.load %arg5[%c0_17, %c0_18, %c0_19, %c0_20] : memref<5x2x24x8xf32, #tpu.memory_space<vmem>>, vector<1x2x24x8xf32>
    %32 = vector.shape_cast %31 : vector<1x2x24x8xf32> to vector<2x24x8xf32>
    %cst_21 = arith.constant dense<0.000000e+00> : vector<2x24x30xf32>
    %33 = tpu.matmul %32, %30, %cst_21 {dimension_numbers = #tpu.dot_dimension_numbers<[2], [1], [1], [2], [0, 0, 0, 1, 1, 2], [0], [0]>} : vector<2x24x8xf32>, vector<2x8x30xf32>, vector<2x24x30xf32> -> vector<2x24x30xf32>
    %c0_22 = arith.constant 0 : index
    %c0_23 = arith.constant 0 : index
    %c0_24 = arith.constant 0 : index
    %34 = vector.load %arg6[%c0_22, %c0_23, %c0_24] : memref<5x24x1xf32, #tpu.memory_space<vmem>>, vector<1x24x1xf32>
    %35 = vector.shape_cast %34 : vector<1x24x1xf32> to vector<24x1xf32>
    %36 = vector.shape_cast %35 : vector<24x1xf32> to vector<1x24x1xf32>
    %37 = vector.broadcast %36 : vector<1x24x1xf32> to vector<2x24x30xf32>
    %38 = arith.addf %33, %37 : vector<2x24x30xf32>
    %39 = vector.extract_strided_slice %38 {offsets = [0, 0, 0], sizes = [2, 16, 30], strides = [1, 1, 1]} : vector<2x24x30xf32> to vector<2x16x30xf32>
    %40 = vector.extract_strided_slice %10 {offsets = [0, 0, 1], sizes = [2, 16, 30], strides = [1, 1, 1]} : vector<2x16x31xf32> to vector<2x16x30xf32>
    %41 = arith.addf %39, %40 : vector<2x16x30xf32>
    %42 = vector.extract_strided_slice %38 {offsets = [0, 16, 0], sizes = [2, 8, 30], strides = [1, 1, 1]} : vector<2x24x30xf32> to vector<2x8x30xf32>
    %43 = vector.extract_strided_slice %9 {offsets = [0, 0, 1], sizes = [2, 8, 30], strides = [1, 1, 1]} : vector<2x8x31xf32> to vector<2x8x30xf32>
    %44 = arith.addf %42, %43 : vector<2x8x30xf32>
    %c1 = arith.constant 1 : index
    %c0_25 = arith.constant 0 : index
    %c0_26 = arith.constant 0 : index
    %c0_27 = arith.constant 0 : index
    %45 = vector.load %arg3[%c1, %c0_25, %c0_26, %c0_27] : memref<5x2x32x8xf32, #tpu.memory_space<vmem>>, vector<1x2x32x8xf32>
    %46 = vector.shape_cast %45 : vector<1x2x32x8xf32> to vector<2x32x8xf32>
    %cst_28 = arith.constant dense<0.000000e+00> : vector<2x32x30xf32>
    %47 = tpu.matmul %46, %44, %cst_28 {dimension_numbers = #tpu.dot_dimension_numbers<[2], [1], [1], [2], [0, 0, 0, 1, 1, 2], [0], [0]>} : vector<2x32x8xf32>, vector<2x8x30xf32>, vector<2x32x30xf32> -> vector<2x32x30xf32>
    %48 = vector.extract_strided_slice %47 {offsets = [0, 0, 0], sizes = [2, 16, 28], strides = [1, 1, 1]} : vector<2x32x30xf32> to vector<2x16x28xf32>
    %49 = vector.extract_strided_slice %47 {offsets = [0, 16, 2], sizes = [2, 16, 28], strides = [1, 1, 1]} : vector<2x32x30xf32> to vector<2x16x28xf32>
    %50 = arith.addf %48, %49 : vector<2x16x28xf32>
    %c1_29 = arith.constant 1 : index
    %c0_30 = arith.constant 0 : index
    %c0_31 = arith.constant 0 : index
    %51 = vector.load %arg4[%c1_29, %c0_30, %c0_31] : memref<5x16x1xf32, #tpu.memory_space<vmem>>, vector<1x16x1xf32>
    %52 = vector.shape_cast %51 : vector<1x16x1xf32> to vector<16x1xf32>
    %53 = vector.shape_cast %52 : vector<16x1xf32> to vector<1x16x1xf32>
    %54 = vector.broadcast %53 : vector<1x16x1xf32> to vector<2x16x28xf32>
    %55 = arith.addf %50, %54 : vector<2x16x28xf32>
    %56 = vector.extract_strided_slice %55 {offsets = [0, 0, 0], sizes = [2, 8, 28], strides = [1, 1, 1]} : vector<2x16x28xf32> to vector<2x8x28xf32>
    %57 = math.tanh %56 : vector<2x8x28xf32>
    %58 = vector.extract_strided_slice %55 {offsets = [0, 8, 0], sizes = [2, 8, 28], strides = [1, 1, 1]} : vector<2x16x28xf32> to vector<2x8x28xf32>
    %59 = arith.negf %58 : vector<2x8x28xf32>
    %60 = math.exp %59 : vector<2x8x28xf32>
    %cst_32 = arith.constant 1.000000e+00 : f32
    %61 = vector.broadcast %cst_32 : f32 to vector<2x8x28xf32>
    %62 = arith.addf %61, %60 : vector<2x8x28xf32>
    %63 = arith.divf %61, %62 : vector<2x8x28xf32>
    %64 = arith.mulf %57, %63 : vector<2x8x28xf32>
    %c1_33 = arith.constant 1 : index
    %c0_34 = arith.constant 0 : index
    %c0_35 = arith.constant 0 : index
    %c0_36 = arith.constant 0 : index
    %65 = vector.load %arg5[%c1_33, %c0_34, %c0_35, %c0_36] : memref<5x2x24x8xf32, #tpu.memory_space<vmem>>, vector<1x2x24x8xf32>
    %66 = vector.shape_cast %65 : vector<1x2x24x8xf32> to vector<2x24x8xf32>
    %cst_37 = arith.constant dense<0.000000e+00> : vector<2x24x28xf32>
    %67 = tpu.matmul %66, %64, %cst_37 {dimension_numbers = #tpu.dot_dimension_numbers<[2], [1], [1], [2], [0, 0, 0, 1, 1, 2], [0], [0]>} : vector<2x24x8xf32>, vector<2x8x28xf32>, vector<2x24x28xf32> -> vector<2x24x28xf32>
    %c1_38 = arith.constant 1 : index
    %c0_39 = arith.constant 0 : index
    %c0_40 = arith.constant 0 : index
    %68 = vector.load %arg6[%c1_38, %c0_39, %c0_40] : memref<5x24x1xf32, #tpu.memory_space<vmem>>, vector<1x24x1xf32>
    %69 = vector.shape_cast %68 : vector<1x24x1xf32> to vector<24x1xf32>
    %70 = vector.shape_cast %69 : vector<24x1xf32> to vector<1x24x1xf32>
    %71 = vector.broadcast %70 : vector<1x24x1xf32> to vector<2x24x28xf32>
    %72 = arith.addf %67, %71 : vector<2x24x28xf32>
    %73 = vector.extract_strided_slice %72 {offsets = [0, 0, 0], sizes = [2, 16, 28], strides = [1, 1, 1]} : vector<2x24x28xf32> to vector<2x16x28xf32>
    %74 = vector.extract_strided_slice %41 {offsets = [0, 0, 2], sizes = [2, 16, 28], strides = [1, 1, 1]} : vector<2x16x30xf32> to vector<2x16x28xf32>
    %75 = arith.addf %73, %74 : vector<2x16x28xf32>
    %76 = vector.extract_strided_slice %72 {offsets = [0, 16, 0], sizes = [2, 8, 28], strides = [1, 1, 1]} : vector<2x24x28xf32> to vector<2x8x28xf32>
    %77 = vector.extract_strided_slice %44 {offsets = [0, 0, 2], sizes = [2, 8, 28], strides = [1, 1, 1]} : vector<2x8x30xf32> to vector<2x8x28xf32>
    %78 = arith.addf %76, %77 : vector<2x8x28xf32>
    %c2 = arith.constant 2 : index
    %c0_41 = arith.constant 0 : index
    %c0_42 = arith.constant 0 : index
    %c0_43 = arith.constant 0 : index
    %79 = vector.load %arg3[%c2, %c0_41, %c0_42, %c0_43] : memref<5x2x32x8xf32, #tpu.memory_space<vmem>>, vector<1x2x32x8xf32>
    %80 = vector.shape_cast %79 : vector<1x2x32x8xf32> to vector<2x32x8xf32>
    %cst_44 = arith.constant dense<0.000000e+00> : vector<2x32x28xf32>
    %81 = tpu.matmul %80, %78, %cst_44 {dimension_numbers = #tpu.dot_dimension_numbers<[2], [1], [1], [2], [0, 0, 0, 1, 1, 2], [0], [0]>} : vector<2x32x8xf32>, vector<2x8x28xf32>, vector<2x32x28xf32> -> vector<2x32x28xf32>
    %82 = vector.extract_strided_slice %81 {offsets = [0, 0, 0], sizes = [2, 16, 24], strides = [1, 1, 1]} : vector<2x32x28xf32> to vector<2x16x24xf32>
    %83 = vector.extract_strided_slice %81 {offsets = [0, 16, 4], sizes = [2, 16, 24], strides = [1, 1, 1]} : vector<2x32x28xf32> to vector<2x16x24xf32>
    %84 = arith.addf %82, %83 : vector<2x16x24xf32>
    %c2_45 = arith.constant 2 : index
    %c0_46 = arith.constant 0 : index
    %c0_47 = arith.constant 0 : index
    %85 = vector.load %arg4[%c2_45, %c0_46, %c0_47] : memref<5x16x1xf32, #tpu.memory_space<vmem>>, vector<1x16x1xf32>
    %86 = vector.shape_cast %85 : vector<1x16x1xf32> to vector<16x1xf32>
    %87 = vector.shape_cast %86 : vector<16x1xf32> to vector<1x16x1xf32>
    %88 = vector.broadcast %87 : vector<1x16x1xf32> to vector<2x16x24xf32>
    %89 = arith.addf %84, %88 : vector<2x16x24xf32>
    %90 = vector.extract_strided_slice %89 {offsets = [0, 0, 0], sizes = [2, 8, 24], strides = [1, 1, 1]} : vector<2x16x24xf32> to vector<2x8x24xf32>
    %91 = math.tanh %90 : vector<2x8x24xf32>
    %92 = vector.extract_strided_slice %89 {offsets = [0, 8, 0], sizes = [2, 8, 24], strides = [1, 1, 1]} : vector<2x16x24xf32> to vector<2x8x24xf32>
    %93 = arith.negf %92 : vector<2x8x24xf32>
    %94 = math.exp %93 : vector<2x8x24xf32>
    %cst_48 = arith.constant 1.000000e+00 : f32
    %95 = vector.broadcast %cst_48 : f32 to vector<2x8x24xf32>
    %96 = arith.addf %95, %94 : vector<2x8x24xf32>
    %97 = arith.divf %95, %96 : vector<2x8x24xf32>
    %98 = arith.mulf %91, %97 : vector<2x8x24xf32>
    %c2_49 = arith.constant 2 : index
    %c0_50 = arith.constant 0 : index
    %c0_51 = arith.constant 0 : index
    %c0_52 = arith.constant 0 : index
    %99 = vector.load %arg5[%c2_49, %c0_50, %c0_51, %c0_52] : memref<5x2x24x8xf32, #tpu.memory_space<vmem>>, vector<1x2x24x8xf32>
    %100 = vector.shape_cast %99 : vector<1x2x24x8xf32> to vector<2x24x8xf32>
    %cst_53 = arith.constant dense<0.000000e+00> : vector<2x24x24xf32>
    %101 = tpu.matmul %100, %98, %cst_53 {dimension_numbers = #tpu.dot_dimension_numbers<[2], [1], [1], [2], [0, 0, 0, 1, 1, 2], [0], [0]>} : vector<2x24x8xf32>, vector<2x8x24xf32>, vector<2x24x24xf32> -> vector<2x24x24xf32>
    %c2_54 = arith.constant 2 : index
    %c0_55 = arith.constant 0 : index
    %c0_56 = arith.constant 0 : index
    %102 = vector.load %arg6[%c2_54, %c0_55, %c0_56] : memref<5x24x1xf32, #tpu.memory_space<vmem>>, vector<1x24x1xf32>
    %103 = vector.shape_cast %102 : vector<1x24x1xf32> to vector<24x1xf32>
    %104 = vector.shape_cast %103 : vector<24x1xf32> to vector<1x24x1xf32>
    %105 = vector.broadcast %104 : vector<1x24x1xf32> to vector<2x24x24xf32>
    %106 = arith.addf %101, %105 : vector<2x24x24xf32>
    %107 = vector.extract_strided_slice %106 {offsets = [0, 0, 0], sizes = [2, 16, 24], strides = [1, 1, 1]} : vector<2x24x24xf32> to vector<2x16x24xf32>
    %108 = vector.extract_strided_slice %75 {offsets = [0, 0, 4], sizes = [2, 16, 24], strides = [1, 1, 1]} : vector<2x16x28xf32> to vector<2x16x24xf32>
    %109 = arith.addf %107, %108 : vector<2x16x24xf32>
    %110 = vector.extract_strided_slice %106 {offsets = [0, 16, 0], sizes = [2, 8, 24], strides = [1, 1, 1]} : vector<2x24x24xf32> to vector<2x8x24xf32>
    %111 = vector.extract_strided_slice %78 {offsets = [0, 0, 4], sizes = [2, 8, 24], strides = [1, 1, 1]} : vector<2x8x28xf32> to vector<2x8x24xf32>
    %112 = arith.addf %110, %111 : vector<2x8x24xf32>
    %c3 = arith.constant 3 : index
    %c0_57 = arith.constant 0 : index
    %c0_58 = arith.constant 0 : index
    %c0_59 = arith.constant 0 : index
    %113 = vector.load %arg3[%c3, %c0_57, %c0_58, %c0_59] : memref<5x2x32x8xf32, #tpu.memory_space<vmem>>, vector<1x2x32x8xf32>
    %114 = vector.shape_cast %113 : vector<1x2x32x8xf32> to vector<2x32x8xf32>
    %cst_60 = arith.constant dense<0.000000e+00> : vector<2x32x24xf32>
    %115 = tpu.matmul %114, %112, %cst_60 {dimension_numbers = #tpu.dot_dimension_numbers<[2], [1], [1], [2], [0, 0, 0, 1, 1, 2], [0], [0]>} : vector<2x32x8xf32>, vector<2x8x24xf32>, vector<2x32x24xf32> -> vector<2x32x24xf32>
    %116 = vector.extract_strided_slice %115 {offsets = [0, 0, 0], sizes = [2, 16, 23], strides = [1, 1, 1]} : vector<2x32x24xf32> to vector<2x16x23xf32>
    %117 = vector.extract_strided_slice %115 {offsets = [0, 16, 1], sizes = [2, 16, 23], strides = [1, 1, 1]} : vector<2x32x24xf32> to vector<2x16x23xf32>
    %118 = arith.addf %116, %117 : vector<2x16x23xf32>
    %c3_61 = arith.constant 3 : index
    %c0_62 = arith.constant 0 : index
    %c0_63 = arith.constant 0 : index
    %119 = vector.load %arg4[%c3_61, %c0_62, %c0_63] : memref<5x16x1xf32, #tpu.memory_space<vmem>>, vector<1x16x1xf32>
    %120 = vector.shape_cast %119 : vector<1x16x1xf32> to vector<16x1xf32>
    %121 = vector.shape_cast %120 : vector<16x1xf32> to vector<1x16x1xf32>
    %122 = vector.broadcast %121 : vector<1x16x1xf32> to vector<2x16x23xf32>
    %123 = arith.addf %118, %122 : vector<2x16x23xf32>
    %124 = vector.extract_strided_slice %123 {offsets = [0, 0, 0], sizes = [2, 8, 23], strides = [1, 1, 1]} : vector<2x16x23xf32> to vector<2x8x23xf32>
    %125 = math.tanh %124 : vector<2x8x23xf32>
    %126 = vector.extract_strided_slice %123 {offsets = [0, 8, 0], sizes = [2, 8, 23], strides = [1, 1, 1]} : vector<2x16x23xf32> to vector<2x8x23xf32>
    %127 = arith.negf %126 : vector<2x8x23xf32>
    %128 = math.exp %127 : vector<2x8x23xf32>
    %cst_64 = arith.constant 1.000000e+00 : f32
    %129 = vector.broadcast %cst_64 : f32 to vector<2x8x23xf32>
    %130 = arith.addf %129, %128 : vector<2x8x23xf32>
    %131 = arith.divf %129, %130 : vector<2x8x23xf32>
    %132 = arith.mulf %125, %131 : vector<2x8x23xf32>
    %c3_65 = arith.constant 3 : index
    %c0_66 = arith.constant 0 : index
    %c0_67 = arith.constant 0 : index
    %c0_68 = arith.constant 0 : index
    %133 = vector.load %arg5[%c3_65, %c0_66, %c0_67, %c0_68] : memref<5x2x24x8xf32, #tpu.memory_space<vmem>>, vector<1x2x24x8xf32>
    %134 = vector.shape_cast %133 : vector<1x2x24x8xf32> to vector<2x24x8xf32>
    %cst_69 = arith.constant dense<0.000000e+00> : vector<2x24x23xf32>
    %135 = tpu.matmul %134, %132, %cst_69 {dimension_numbers = #tpu.dot_dimension_numbers<[2], [1], [1], [2], [0, 0, 0, 1, 1, 2], [0], [0]>} : vector<2x24x8xf32>, vector<2x8x23xf32>, vector<2x24x23xf32> -> vector<2x24x23xf32>
    %c3_70 = arith.constant 3 : index
    %c0_71 = arith.constant 0 : index
    %c0_72 = arith.constant 0 : index
    %136 = vector.load %arg6[%c3_70, %c0_71, %c0_72] : memref<5x24x1xf32, #tpu.memory_space<vmem>>, vector<1x24x1xf32>
    %137 = vector.shape_cast %136 : vector<1x24x1xf32> to vector<24x1xf32>
    %138 = vector.shape_cast %137 : vector<24x1xf32> to vector<1x24x1xf32>
    %139 = vector.broadcast %138 : vector<1x24x1xf32> to vector<2x24x23xf32>
    %140 = arith.addf %135, %139 : vector<2x24x23xf32>
    %141 = vector.extract_strided_slice %140 {offsets = [0, 0, 0], sizes = [2, 16, 23], strides = [1, 1, 1]} : vector<2x24x23xf32> to vector<2x16x23xf32>
    %142 = vector.extract_strided_slice %109 {offsets = [0, 0, 1], sizes = [2, 16, 23], strides = [1, 1, 1]} : vector<2x16x24xf32> to vector<2x16x23xf32>
    %143 = arith.addf %141, %142 : vector<2x16x23xf32>
    %144 = vector.extract_strided_slice %140 {offsets = [0, 16, 0], sizes = [2, 8, 23], strides = [1, 1, 1]} : vector<2x24x23xf32> to vector<2x8x23xf32>
    %145 = vector.extract_strided_slice %112 {offsets = [0, 0, 1], sizes = [2, 8, 23], strides = [1, 1, 1]} : vector<2x8x24xf32> to vector<2x8x23xf32>
    %146 = arith.addf %144, %145 : vector<2x8x23xf32>
    %c4 = arith.constant 4 : index
    %c0_73 = arith.constant 0 : index
    %c0_74 = arith.constant 0 : index
    %c0_75 = arith.constant 0 : index
    %147 = vector.load %arg3[%c4, %c0_73, %c0_74, %c0_75] : memref<5x2x32x8xf32, #tpu.memory_space<vmem>>, vector<1x2x32x8xf32>
    %148 = vector.shape_cast %147 : vector<1x2x32x8xf32> to vector<2x32x8xf32>
    %cst_76 = arith.constant dense<0.000000e+00> : vector<2x32x23xf32>
    %149 = tpu.matmul %148, %146, %cst_76 {dimension_numbers = #tpu.dot_dimension_numbers<[2], [1], [1], [2], [0, 0, 0, 1, 1, 2], [0], [0]>} : vector<2x32x8xf32>, vector<2x8x23xf32>, vector<2x32x23xf32> -> vector<2x32x23xf32>
    %150 = vector.extract_strided_slice %149 {offsets = [0, 0, 0], sizes = [2, 16, 21], strides = [1, 1, 1]} : vector<2x32x23xf32> to vector<2x16x21xf32>
    %151 = vector.extract_strided_slice %149 {offsets = [0, 16, 2], sizes = [2, 16, 21], strides = [1, 1, 1]} : vector<2x32x23xf32> to vector<2x16x21xf32>
    %152 = arith.addf %150, %151 : vector<2x16x21xf32>
    %c4_77 = arith.constant 4 : index
    %c0_78 = arith.constant 0 : index
    %c0_79 = arith.constant 0 : index
    %153 = vector.load %arg4[%c4_77, %c0_78, %c0_79] : memref<5x16x1xf32, #tpu.memory_space<vmem>>, vector<1x16x1xf32>
    %154 = vector.shape_cast %153 : vector<1x16x1xf32> to vector<16x1xf32>
    %155 = vector.shape_cast %154 : vector<16x1xf32> to vector<1x16x1xf32>
    %156 = vector.broadcast %155 : vector<1x16x1xf32> to vector<2x16x21xf32>
    %157 = arith.addf %152, %156 : vector<2x16x21xf32>
    %158 = vector.extract_strided_slice %157 {offsets = [0, 0, 0], sizes = [2, 8, 21], strides = [1, 1, 1]} : vector<2x16x21xf32> to vector<2x8x21xf32>
    %159 = math.tanh %158 : vector<2x8x21xf32>
    %160 = vector.extract_strided_slice %157 {offsets = [0, 8, 0], sizes = [2, 8, 21], strides = [1, 1, 1]} : vector<2x16x21xf32> to vector<2x8x21xf32>
    %161 = arith.negf %160 : vector<2x8x21xf32>
    %162 = math.exp %161 : vector<2x8x21xf32>
    %cst_80 = arith.constant 1.000000e+00 : f32
    %163 = vector.broadcast %cst_80 : f32 to vector<2x8x21xf32>
    %164 = arith.addf %163, %162 : vector<2x8x21xf32>
    %165 = arith.divf %163, %164 : vector<2x8x21xf32>
    %166 = arith.mulf %159, %165 : vector<2x8x21xf32>
    %c4_81 = arith.constant 4 : index
    %c0_82 = arith.constant 0 : index
    %c0_83 = arith.constant 0 : index
    %c0_84 = arith.constant 0 : index
    %167 = vector.load %arg5[%c4_81, %c0_82, %c0_83, %c0_84] : memref<5x2x24x8xf32, #tpu.memory_space<vmem>>, vector<1x2x24x8xf32>
    %168 = vector.shape_cast %167 : vector<1x2x24x8xf32> to vector<2x24x8xf32>
    %cst_85 = arith.constant dense<0.000000e+00> : vector<2x24x21xf32>
    %169 = tpu.matmul %168, %166, %cst_85 {dimension_numbers = #tpu.dot_dimension_numbers<[2], [1], [1], [2], [0, 0, 0, 1, 1, 2], [0], [0]>} : vector<2x24x8xf32>, vector<2x8x21xf32>, vector<2x24x21xf32> -> vector<2x24x21xf32>
    %c4_86 = arith.constant 4 : index
    %c0_87 = arith.constant 0 : index
    %c0_88 = arith.constant 0 : index
    %170 = vector.load %arg6[%c4_86, %c0_87, %c0_88] : memref<5x24x1xf32, #tpu.memory_space<vmem>>, vector<1x24x1xf32>
    %171 = vector.shape_cast %170 : vector<1x24x1xf32> to vector<24x1xf32>
    %172 = vector.shape_cast %171 : vector<24x1xf32> to vector<1x24x1xf32>
    %173 = vector.broadcast %172 : vector<1x24x1xf32> to vector<2x24x21xf32>
    %174 = arith.addf %169, %173 : vector<2x24x21xf32>
    %175 = vector.extract_strided_slice %174 {offsets = [0, 0, 0], sizes = [2, 16, 21], strides = [1, 1, 1]} : vector<2x24x21xf32> to vector<2x16x21xf32>
    %176 = vector.extract_strided_slice %143 {offsets = [0, 0, 2], sizes = [2, 16, 21], strides = [1, 1, 1]} : vector<2x16x23xf32> to vector<2x16x21xf32>
    %177 = arith.addf %175, %176 : vector<2x16x21xf32>
    %c0_89 = arith.constant 0 : index
    %c0_90 = arith.constant 0 : index
    %c0_91 = arith.constant 0 : index
    %178 = vector.load %arg7[%c0_89, %c0_90, %c0_91] : memref<2x4x16xf32, #tpu.memory_space<vmem>>, vector<2x4x16xf32>
    %cst_92 = arith.constant 0.000000e+00 : f32
    %179 = vector.broadcast %cst_92 : f32 to vector<2x16x21xf32>
    %180 = arith.maximumf %177, %179 : vector<2x16x21xf32>
    %cst_93 = arith.constant dense<0.000000e+00> : vector<2x4x21xf32>
    %181 = tpu.matmul %178, %180, %cst_93 {dimension_numbers = #tpu.dot_dimension_numbers<[2], [1], [1], [2], [0, 0, 0, 1, 1, 2], [0], [0]>} : vector<2x4x16xf32>, vector<2x16x21xf32>, vector<2x4x21xf32> -> vector<2x4x21xf32>
    %c0_94 = arith.constant 0 : index
    %c0_95 = arith.constant 0 : index
    %182 = vector.load %arg8[%c0_94, %c0_95] : memref<4x1xf32, #tpu.memory_space<vmem>>, vector<4x1xf32>
    %183 = vector.shape_cast %182 : vector<4x1xf32> to vector<1x4x1xf32>
    %184 = vector.broadcast %183 : vector<1x4x1xf32> to vector<2x4x21xf32>
    %185 = arith.addf %181, %184 : vector<2x4x21xf32>
    %c0_96 = arith.constant 0 : index
    %c0_97 = arith.constant 0 : index
    %c0_98 = arith.constant 0 : index
    %186 = vector.load %arg9[%c0_96, %c0_97, %c0_98] : memref<2x4x21xf32, #tpu.memory_space<vmem>>, vector<2x4x21xf32>
    tpu.vector_store %arg9[%c0_96, %c0_97, %c0_98], %185 {strides = array<i32>} : memref<2x4x21xf32, #tpu.memory_space<vmem>>, vector<2x4x21xf32>,
    return
  }
}

</mosaic_0001>

<bundles_post_ra>
// kernel: wavenet_forward_pallas.1
= control target key start
LH: loop header
LB: loop body
LE: loop exit
PB: predicated region body
PF: predicated region fallthrough
CT: control target
= control target key end

     0   :  { %vm46_vm0 = vcmask 1043456   ;;  %vm39_vm1 = vcmask 31744   ;;  %s4027_s0 = inlined_call_operand.vmem [shape: f32[2,4,32], index: 0, kind: input, shape index: {}]   ;;  %s4028_s1 = inlined_call_operand.vmem [shape: f32[2,16,4], index: 1, kind: input, shape index: {}]   ;;  %s4029_s2 = inlined_call_operand.vmem [shape: f32[8,1], index: 2, kind: input, shape index: {}]   ;;  %s4030_s3 = inlined_call_operand.vmem [shape: f32[5,2,32,8], index: 3, kind: input, shape index: {}]   ;;  %s4031_s4 = inlined_call_operand.vmem [shape: f32[5,16,1], index: 4, kind: input, shape index: {}]   ;;  %s4032_s5 = inlined_call_operand.vmem [shape: f32[5,2,24,8], index: 5, kind: input, shape index: {}]   ;;  %s4033_s6 = inlined_call_operand.vmem [shape: f32[5,24,1], index: 6, kind: input, shape index: {}]   ;;  %s4034_s7 = inlined_call_operand.vmem [shape: f32[2,4,16], index: 7, kind: input, shape index: {}]   ;;  %s4035_s8 = inlined_call_operand.vmem [shape: f32[4,1], index: 8, kind: input, shape index: {}]   ;;  %s4036_s9 = inlined_call_operand.hbm [shape: f32[2,4,21], index: 9, kind: output, shape index: {}]  }
   0x1   :  { %v33_v0 = vld [vmem:[%s4027_s0] sm:$0xf]  ;;  %v34_v1 = vld [vmem:[%s4027_s0 + $0x4] sm:$0xf]  ;;  %v37_v3 = vld [vmem:[%s4028_s1 + $0x10] sm:$0xff] }
   0x2   :  { %v35_v2 = vld [vmem:[%s4028_s1] sm:$0xff]  ;;  %3089 = vmatprep.subr.msk.mxu0 %vm46_vm0, %v33_v0  ;;  %3094 = vmatprep.subr.msk.mxu1 %vm46_vm0, %v34_v1  ;;  %v36_v4 = vld [vmem:[%s4028_s1 + $0x8] sm:$0xff]  ;;  %v38_v5 = vld [vmem:[%s4028_s1 + $0x18] sm:$0xff] }
   0x3   :  { %3090 = vmatpush3.msk.msra.mxu0 %vm46_vm0, %v33_v0  ;;  %3091 = vmatprep.mubr.msk.f32.mxu0 %vm39_vm1, %v35_v2 }
   0x4   :  { %14 = vsyncpa [#allocation3], 0  ;;  %3095 = vmatpush3.msk.msra.mxu1 %vm46_vm0, %v34_v1  ;;  %3096 = vmatprep.mubr.msk.f32.mxu1 %vm39_vm1, %v37_v3  ;;  %v219_v6 = vld [vmem:[%s4029_s2] sm:$0xff]  ;;  %v3405_v7 = vmov 0   ;;  %vm235_vm2 = vcmask 64512   ;;  %s3406_s2 = smov 127  }
   0x5   :  { %3092 = vmatmul.mubr.msk.f32.vlgmr.msra.gmra.mrb[0].mxu0 %vm39_vm1, %v36_v4  ;;  %3097 = vmatmul.mubr.msk.f32.vlgmr.msra.gmra.mrb[0].mxu1 %vm39_vm1, %v38_v5  ;;  %v227_v8 = vld [vmem:[%s4030_s3] sm:$0xff]  ;;  %v451_v14 = vld [vmem:[%s4031_s4 + $0x8] sm:$0xff]  ;;  %v229_v24 = vld [vmem:[%s4030_s3 + $0x10] sm:$0xff]  ;;  %v3407_v39 = vmov 0.0   ;;  %vm3408_vm3 = vmmov 0   ;;  %s3409_s27 = smov 126  }
   0x6   :  { %3319 = vset.pattern.permute.xlu0 %v3405_v7  ;;  %3320 = vset.pattern.permute.xlu1 %v3405_v7  ;;  %v231_v9 = vld [vmem:[%s4030_s3 + $0x20] sm:$0xff]  ;;  %v228_v22 = vld [vmem:[%s4030_s3 + $0x8] sm:$0xff]  ;;  %v233_v25 = vld [vmem:[%s4030_s3 + $0x30] sm:$0xff]  ;;  %s3410_s19 = smov 124   ;;  %vm2657_vm4 = vcmask 130048   ;;  %vm2804_vm5 = vcmask 166912  }
   0x7   :  { %222 = vperm.xlu0 %3319, %v219_v6   ;;  %3101 = vmatprep.mubr.msk.f32.mxu0 %vm235_vm2, %v227_v8  ;;  %v232_v23 = vld [vmem:[%s4030_s3 + $0x28] sm:$0xff]  ;;  %v230_v26 = vld [vmem:[%s4030_s3 + $0x18] sm:$0xff]  ;;  %v450_v36 = vld [vmem:[%s4031_s4] sm:$0xff]  ;;  %s3412_s12 = smov [#allocation2]  }
   0x8   :  { %3109 = vmatprep.mubr.msk.f32.mxu1 %vm235_vm2, %v231_v9  ;;  %v234_v27 = vld [vmem:[%s4030_s3 + $0x38] sm:$0xff]  ;;  %v490_v37 = vld [vmem:[%s4033_s6 + $0x10] sm:$0xff]  ;;  %v482_v63 = vld [vmem:[%s4032_s5] sm:$0xff]  ;;  %s2812_s13 = sshll.u32 %s3412_s12, 4  ;;  %s2813_s13 = int_to_ptr.vmem [resolvable:$true] %s2812_s13 }
   0x9   :  { %v2862_v38 = vld [vmem:[%s4031_s4 + $0x18] sm:$0xff]  ;;  %v483_v2 = vld [vmem:[%s4032_s5 + $0x8] sm:$0xff]  ;;  %v484_v5 = vld [vmem:[%s4032_s5 + $0x10] sm:$0xff]  ;;  %s3381_s14 = scalar_lea.vmem %s2813_s13, 128  ;;  %p3386_p1 = scmp.lt.s32.totalorder %s2813_s13, %s2813_s13 }
   0xa   :  { %v485_v4 = vld [vmem:[%s4032_s5 + $0x18] sm:$0xff]  ;;  %v486_v6 = vld [vmem:[%s4032_s5 + $0x20] sm:$0xff]  ;;  %v487_v7 = vld [vmem:[%s4032_s5 + $0x28] sm:$0xff]  ;;  %p3382_p0 = scmp.ne.s32.totalorder %s2813_s13, %s3381_s14  ;;  %p3387_p2 = scmp.lt.s32.totalorder %s3381_s14, %s3381_s14 }
   0xb   :  { %v2845_v8 = vld [vmem:[%s4030_s3 + $0x40] sm:$0xff] }
   0xc   :  { %v2849_v9 = vld [vmem:[%s4030_s3 + $0x60] sm:$0xff]  ;;  %p3388_p3 = por %p3387_p2, %p3386_p1 }
   0xe   :  { %p3389_p4 = pnand %p3388_p3, %p3382_p0 }
  0x86   :  { %v223_v15 = vpop.permute.xlu0 %222 }
  0xd8   :  { %v3093_v10 = vpop.f32.mrb[0].mxu0  ;;  %v3098_v11 = vpop.f32.mrb[0].mxu1 }
  0xd9   :  { %213 = vrot.lane.b32.xlu1 %v3098_v11, %s3406_s2  ;;  %211 = vrot.lane.b32.xlu0 %v3093_v10, %s3406_s2  ;;  %v116_v12 = vpop.f32.mrb[1].mxu0  ;;  %v200_v13 = vpop.f32.mrb[1].mxu1 }
  0xdd   :  { %459 = vperm.xlu1 %3320, %v451_v14  }
 0x14b   :  { %v214_v16 = vpop.permute.xlu1 %213  ;;  %v212_v17 = vpop.permute.xlu0 %211 }
 0x14c   :  { %v218_v18 = vadd.f32 %v214_v16, %v200_v13  ;;  %v217_v19 = vadd.f32 %v212_v17, %v116_v12 }
 0x14e   :  { %v226_v20 = vadd.f32 %v223_v15, %v218_v18  ;;  %v225_v21 = vadd.f32 %v223_v15, %v217_v19 }
 0x150   :  { %3099 = vmatprep.subr.mxu0 %v225_v21  ;;  %3107 = vmatprep.subr.mxu1 %v226_v20 }
 0x151   :  { %3100 = vmatpush3.msra.mxu0 %v225_v21  ;;  %3108 = vmatpush3.msra.mxu1 %v226_v20 }
 0x152   :  { %3102 = vmatmul.mubr.msk.f32.vlgmr.msra.gmra.mrb[2].mxu0 %vm235_vm2, %v228_v22  ;;  %3110 = vmatmul.mubr.msk.f32.vlgmr.msra.gmra.mrb[2].mxu1 %vm235_vm2, %v232_v23 }
 0x153   :  { %3104 = vmatprep.mubr.msk.f32.mxu0 %vm235_vm2, %v229_v24  ;;  %3112 = vmatprep.mubr.msk.f32.mxu1 %vm235_vm2, %v233_v25  ;;  %v2846_v25 = vld [vmem:[%s4030_s3 + $0x48] sm:$0xff] }
 0x154   :  { %3115 = vmatprep.subr.mxu0 %v3407_v39  ;;  %3126 = vmatprep.subr.mxu1 %v3407_v39 }
 0x156   :  { %3105 = vmatmul.mubr.msk.f32.gmra.mrb[4].mxu0 %vm235_vm2, %v230_v26  ;;  %3113 = vmatmul.mubr.msk.f32.gmra.mrb[4].mxu1 %vm235_vm2, %v234_v27 }
 0x157   :  { %3117 = vmatprep.mubr.msk.f32.mxu0 %vm3408_vm3, %v3407_v39  ;;  %3128 = vmatprep.mubr.msk.f32.mxu1 %vm3408_vm3, %v3407_v39 }
 0x15c   :  { %v460_v40 = vpop.permute.xlu1 %459 }
 0x225   :  { %v3103_v28 = vpop.f32.mrb[2].mxu0  ;;  %v3111_v29 = vpop.f32.mrb[2].mxu1 }
 0x226   :  { %v314_v30 = vpop.f32.mrb[3].mxu0  ;;  %v411_v31 = vpop.f32.mrb[3].mxu1 }
 0x229   :  { %v3106_v32 = vpop.f32.mrb[4].mxu0  ;;  %v3114_v33 = vpop.f32.mrb[4].mxu1 }
 0x22a   :  { %440 = vrot.lane.b32.xlu1 %v3114_v33, %s3406_s2  ;;  %436 = vrot.lane.b32.xlu0 %v3106_v32, %s3406_s2  ;;  %v324_v34 = vpop.f32.mrb[5].mxu0  ;;  %v421_v35 = vpop.f32.mrb[5].mxu1  ;;  %v2850_v32 = vld [vmem:[%s4030_s3 + $0x68] sm:$0xff]  ;;  %v2851_v33 = vld [vmem:[%s4030_s3 + $0x70] sm:$0xff] }
 0x22e   :  { %454 = vperm.xlu0 %3319, %v450_v36   ;;  %434 = vrot.lane.b32.xlu1 %v324_v34, %s3406_s2  ;;  %v2852_v34 = vld [vmem:[%s4030_s3 + $0x78] sm:$0xff] }
 0x232   :  { %438 = vrot.lane.b32.xlu0 %v421_v35, %s3406_s2  ;;  %503 = vperm.xlu1 %3320, %v490_v37  }
 0x236   :  { %690 = vrot.lane.b32.xlu0 %v225_v21, %s3406_s2  ;;  %692 = vrot.lane.b32.xlu1 %v226_v20, %s3406_s2 }
 0x23a   :  { %931 = vperm.xlu0 %3319, %v2862_v38  }
 0x29c   :  { %v441_v41 = vpop.permute.xlu1 %440  ;;  %v437_v42 = vpop.permute.xlu0 %436 }
 0x29d   :  { %v449_v43 = vadd.f32 %v3111_v29, %v441_v41  ;;  %v447_v44 = vadd.f32 %v3103_v28, %v437_v42  ;;  %v2847_v28 = vld [vmem:[%s4030_s3 + $0x50] sm:$0xff] }
 0x29e   :  { %v2861_v42 = vld [vmem:[%s4031_s4 + $0x10] sm:$0xff] }
 0x29f   :  { %v465_v45 = vadd.f32 %v460_v40, %v449_v43  ;;  %v463_v46 = vadd.f32 %v460_v40, %v447_v44 }
 0x2a0   :  { %v435_v49 = vpop.permute.xlu1 %434 }
 0x2a1   :  { %v2838_v47 = vmul.f32 -1.442695, %v465_v45  ;;  %v2837_v48 = vmul.f32 -1.442695, %v463_v46  ;;  %v446_v50 = vadd.f32 %v435_v49, %v314_v30  ;;  %v2873_v45 = vld [vmem:[%s4033_s6 + $0x28] sm:$0xff] }
 0x2a2   :  { %v2897_v46 = vld [vmem:[%s4031_s4 + $0x28] sm:$0xff] }
 0x2a3   :  { %3321 = vpow2.f32 %v2838_v47 }
 0x2a4   :  { %3323 = vpow2.f32 %v2837_v48 }
 0x2ad   :  { %v3322_v51 = vpop.eup %3321  ;;  %v455_v52 = vpop.permute.xlu0 %454 }
 0x2ae   :  { %v3324_v53 = vpop.eup %3323  ;;  %v462_v54 = vadd.f32 %v455_v52, %v446_v50  ;;  %v475_v56 = vadd.f32 1.0, %v3322_v51 }
 0x2af   :  { %v474_v55 = vadd.f32 1.0, %v3324_v53 }
 0x2b1   :  { %3325 = vrcp.f32 %v474_v55  ;;  %v439_v57 = vpop.permute.xlu0 %438  ;;  %v504_v16 = vpop.permute.xlu1 %503 }
 0x2b2   :  { %3327 = vtanh.f32 %v462_v54  ;;  %v448_v58 = vadd.f32 %v439_v57, %v411_v31  ;;  %v2848_v31 = vld [vmem:[%s4030_s3 + $0x58] sm:$0xff] }
 0x2b3   :  { %3329 = vrcp.f32 %v475_v56 }
 0x2b4   :  { %v464_v59 = vadd.f32 %v455_v52, %v448_v58 }
 0x2b5   :  { %v691_v22 = vpop.permute.xlu0 %690  ;;  %v693_v29 = vpop.permute.xlu1 %692 }
 0x2b6   :  { %3331 = vtanh.f32 %v464_v59 }
 0x2b9   :  { %v932_v47 = vpop.permute.xlu0 %931 }
 0x2bb   :  { %v3326_v60 = vpop.eup %3325 }
 0x2bc   :  { %v3328_v61 = vpop.eup %3327 }
 0x2bd   :  { %v480_v62 = vmul.f32 %v3328_v61, %v3326_v60  ;;  %v3330_v0 = vpop.eup %3329 }
 0x2bf   :  { %3116 = vmatpush3.msra.mxu0 %v480_v62 }
 0x2c0   :  { %v3332_v1 = vpop.eup %3331  ;;  %3118 = vmatmul.mubr.msk.f32.vlgmr.msra.gmra.mrb[6].mxu0 %vm235_vm2, %v482_v63 }
 0x2c1   :  { %3120 = vmatprep.mubr.msk.f32.mxu0 %vm3408_vm3, %v3407_v39  ;;  %v481_v3 = vmul.f32 %v3332_v1, %v3330_v0 }
 0x2c3   :  { %3127 = vmatpush3.msra.mxu1 %v481_v3 }
 0x2c4   :  { %3121 = vmatmul.mubr.msk.f32.gmra.mrb[8].mxu0 %vm235_vm2, %v483_v2  ;;  %3129 = vmatmul.mubr.msk.f32.vlgmr.msra.gmra.mrb[6].mxu1 %vm235_vm2, %v485_v4 }
 0x2c5   :  { %3123 = vmatprep.mubr.msk.f32.mxu0 %vm3408_vm3, %v3407_v39  ;;  %3131 = vmatprep.mubr.msk.f32.mxu1 %vm3408_vm3, %v3407_v39 }
 0x2c8   :  { %3124 = vmatmul.mubr.msk.f32.gmra.mrb[10].mxu0 %vm235_vm2, %v484_v5  ;;  %3132 = vmatmul.mubr.msk.f32.gmra.mrb[8].mxu1 %vm235_vm2, %v486_v6  ;;  %v2865_v6 = vld [vmem:[%s4032_s5 + $0x30] sm:$0xff] }
 0x2c9   :  { %3134 = vmatprep.mubr.msk.f32.mxu1 %vm3408_vm3, %v3407_v39  ;;  %3139 = vmatprep.mubr.msk.f32.mxu0 %vm235_vm2, %v2845_v8 }
 0x2cc   :  { %3135 = vmatmul.mubr.msk.f32.gmra.mrb[10].mxu1 %vm235_vm2, %v487_v7 }
 0x2cd   :  { %3147 = vmatprep.mubr.msk.f32.mxu1 %vm235_vm2, %v2849_v9  ;;  %v2866_v9 = vld [vmem:[%s4032_s5 + $0x38] sm:$0xff] }
 0x393   :  { %v3584_v10 = vpop.f32.mrb[6].mxu0 }
 0x394   :  { %v3119_v11 = vpop.f32.mrb[7].mxu0 }
 0x397   :  { %v3586_v12 = vpop.f32.mrb[8].mxu0  ;;  %v3588_v13 = vpop.f32.mrb[6].mxu1 }
 0x398   :  { %v3122_v14 = vpop.f32.mrb[9].mxu0  ;;  %v3130_v15 = vpop.f32.mrb[7].mxu1 }
 0x399   :  { %v2868_v14 = vld [vmem:[%s4032_s5 + $0x48] sm:$0xff]  ;;  %v2867_v15 = vld [vmem:[%s4032_s5 + $0x40] sm:$0xff] }
 0x39b   :  { %v591_v17 = vpop.f32.mrb[10].mxu0  ;;  %v3590_v18 = vpop.f32.mrb[8].mxu1 }
 0x39c   :  { %v592_v19 = vadd.f32 %v591_v17, %v504_v16  ;;  %v3125_v20 = vpop.f32.mrb[11].mxu0  ;;  %v3133_v21 = vpop.f32.mrb[9].mxu1  ;;  %v2870_v17 = vld [vmem:[%s4032_s5 + $0x58] sm:$0xff] }
 0x39d   :  { %v2884_v20 = vld [vmem:[%s4030_s3 + $0xa0] sm:$0xff] }
 0x39e   :  { %v696_v23 = vadd.f32 %v691_v22, %v592_v19  ;;  %v2880_v19 = vld [vmem:[%s4030_s3 + $0x80] sm:$0xff] }
 0x39f   :  { %v680_v24 = vpop.f32.mrb[10].mxu1 }
 0x3a0   :  { %3137 = vmatprep.subr.mxu0 %v696_v23  ;;  %v681_v26 = vadd.f32 %v680_v24, %v504_v16  ;;  %v3136_v27 = vpop.f32.mrb[11].mxu1  ;;  %v2869_v16 = vld [vmem:[%s4032_s5 + $0x50] sm:$0xff] }
 0x3a1   :  { %3138 = vmatpush3.msra.mxu0 %v696_v23 }
 0x3a2   :  { %v697_v30 = vadd.f32 %v693_v29, %v681_v26  ;;  %3140 = vmatmul.mubr.msk.f32.vlgmr.msra.gmra.mrb[12].mxu0 %vm235_vm2, %v2846_v25  ;;  %3153 = vmatprep.subr.mxu0 %v3407_v39 }
 0x3a3   :  { %3142 = vmatprep.mubr.msk.f32.mxu0 %vm235_vm2, %v2847_v28 }
 0x3a4   :  { %3145 = vmatprep.subr.mxu1 %v697_v30 }
 0x3a5   :  { %3146 = vmatpush3.msra.mxu1 %v697_v30 }
 0x3a6   :  { %3143 = vmatmul.mubr.msk.f32.gmra.mrb[14].mxu0 %vm235_vm2, %v2848_v31  ;;  %3148 = vmatmul.mubr.msk.f32.vlgmr.msra.gmra.mrb[12].mxu1 %vm235_vm2, %v2850_v32 }
 0x3a7   :  { %3150 = vmatprep.mubr.msk.f32.mxu1 %vm235_vm2, %v2851_v33  ;;  %3155 = vmatprep.mubr.msk.f32.mxu0 %vm3408_vm3, %v3407_v39 }
 0x3a8   :  { %3164 = vmatprep.subr.mxu1 %v3407_v39 }
 0x3aa   :  { %3151 = vmatmul.mubr.msk.f32.gmra.mrb[14].mxu1 %vm235_vm2, %v2852_v34 }
 0x3ab   :  { %3166 = vmatprep.mubr.msk.f32.mxu1 %vm3408_vm3, %v3407_v39 }
 0x475   :  { %v3141_v35 = vpop.f32.mrb[12].mxu0 }
 0x476   :  { %v785_v36 = vpop.f32.mrb[13].mxu0 }
 0x479   :  { %v3144_v37 = vpop.f32.mrb[14].mxu0  ;;  %v3149_v38 = vpop.f32.mrb[12].mxu1 }
 0x47a   :  { %907 = vrot.lane.b32.xlu1 %v3144_v37, %s3409_s27  ;;  %v795_v40 = vpop.f32.mrb[15].mxu0  ;;  %v882_v41 = vpop.f32.mrb[13].mxu1  ;;  %v2882_v37 = vld [vmem:[%s4030_s3 + $0x90] sm:$0xff] }
 0x47d   :  { %v3152_v43 = vpop.f32.mrb[14].mxu1 }
 0x47e   :  { %926 = vperm.xlu1 %3320, %v2861_v42   ;;  %911 = vrot.lane.b32.xlu0 %v3152_v43, %s3409_s27  ;;  %v892_v44 = vpop.f32.mrb[15].mxu1  ;;  %v2883_v43 = vld [vmem:[%s4030_s3 + $0x98] sm:$0xff] }
 0x482   :  { %909 = vrot.lane.b32.xlu1 %v892_v44, %s3409_s27  ;;  %905 = vrot.lane.b32.xlu0 %v795_v40, %s3409_s27  ;;  %v2885_v44 = vld [vmem:[%s4030_s3 + $0xa8] sm:$0xff] }
 0x486   :  { %1180 = vrot.lane.b32.xlu1 %v696_v23, %s3409_s27  ;;  %977 = vperm.xlu0 %3319, %v2873_v45   ;;  %v2886_v45 = vld [vmem:[%s4030_s3 + $0xb0] sm:$0xff] }
 0x48a   :  { %1421 = vperm.xlu1 %3320, %v2897_v46   ;;  %1182 = vrot.lane.b32.xlu0 %v697_v30, %s3409_s27  ;;  %v2887_v46 = vld [vmem:[%s4030_s3 + $0xb8] sm:$0xff] }
 0x4ec   :  { %v908_v48 = vpop.permute.xlu1 %907 }
 0x4ed   :  { %v918_v49 = vadd.f32 %v3141_v35, %v908_v48  ;;  %v2881_v35 = vld [vmem:[%s4030_s3 + $0x88] sm:$0xff] }
 0x4ef   :  { %v935_v50 = vadd.f32 %v932_v47, %v918_v49 }
 0x4f0   :  { %v912_v51 = vpop.permute.xlu0 %911 }
 0x4f1   :  { %v2863_v52 = vmul.f32 -1.442695, %v935_v50  ;;  %v920_v53 = vadd.f32 %v3149_v38, %v912_v51 }
 0x4f3   :  { %3333 = vpow2.f32 %v2863_v52  ;;  %v937_v54 = vadd.f32 %v932_v47, %v920_v53  ;;  %v2896_v53 = vld [vmem:[%s4031_s4 + $0x20] sm:$0xff] }
 0x4f4   :  { %v906_v56 = vpop.permute.xlu0 %905 }
 0x4f5   :  { %v2864_v55 = vmul.f32 -1.442695, %v937_v54  ;;  %v917_v57 = vadd.f32 %v906_v56, %v785_v36  ;;  %v2908_v56 = vld [vmem:[%s4033_s6 + $0x40] sm:$0xff] }
 0x4f7   :  { %3335 = vpow2.f32 %v2864_v55 }
 0x4fd   :  { %v3334_v58 = vpop.eup %3333  ;;  %v927_v59 = vpop.permute.xlu1 %926 }
 0x4fe   :  { %v946_v60 = vadd.f32 1.0, %v3334_v58  ;;  %v934_v61 = vadd.f32 %v927_v59, %v917_v57  ;;  %v2932_v57 = vld [vmem:[%s4031_s4 + $0x38] sm:$0xff] }
 0x500   :  { %3337 = vrcp.f32 %v946_v60 }
 0x501   :  { %v3336_v62 = vpop.eup %3335  ;;  %3339 = vtanh.f32 %v934_v61  ;;  %v910_v63 = vpop.permute.xlu1 %909 }
 0x502   :  { %v947_v0 = vadd.f32 1.0, %v3336_v62  ;;  %v919_v1 = vadd.f32 %v910_v63, %v882_v41 }
 0x504   :  { %3341 = vrcp.f32 %v947_v0  ;;  %v936_v2 = vadd.f32 %v927_v59, %v919_v1 }
 0x505   :  { %v978_v27 = vpop.permute.xlu0 %977  ;;  %v1181_v32 = vpop.permute.xlu1 %1180 }
 0x506   :  { %3343 = vtanh.f32 %v936_v2 }
 0x509   :  { %v1183_v41 = vpop.permute.xlu0 %1182  ;;  %v1422_v59 = vpop.permute.xlu1 %1421 }
 0x50a   :  { %v3338_v3 = vpop.eup %3337 }
 0x50b   :  { %v3340_v4 = vpop.eup %3339 }
 0x50c   :  { %v952_v5 = vmul.f32 %v3340_v4, %v3338_v3 }
 0x50e   :  { %v3342_v7 = vpop.eup %3341  ;;  %3154 = vmatpush3.msra.mxu0 %v952_v5 }
 0x50f   :  { %3156 = vmatmul.mubr.msk.f32.vlgmr.msra.gmra.mrb[16].mxu0 %vm235_vm2, %v2865_v6 }
 0x510   :  { %v3344_v8 = vpop.eup %3343  ;;  %3158 = vmatprep.mubr.msk.f32.mxu0 %vm3408_vm3, %v3407_v39 }
 0x511   :  { %v953_v11 = vmul.f32 %v3344_v8, %v3342_v7 }
 0x513   :  { %3159 = vmatmul.mubr.msk.f32.gmra.mrb[18].mxu0 %vm235_vm2, %v2866_v9  ;;  %3165 = vmatpush3.msra.mxu1 %v953_v11 }
 0x514   :  { %3167 = vmatmul.mubr.msk.f32.vlgmr.msra.gmra.mrb[16].mxu1 %vm235_vm2, %v2868_v14  ;;  %3161 = vmatprep.mubr.msk.f32.mxu0 %vm3408_vm3, %v3407_v39 }
 0x515   :  { %3169 = vmatprep.mubr.msk.f32.mxu1 %vm3408_vm3, %v3407_v39 }
 0x517   :  { %3162 = vmatmul.mubr.msk.f32.gmra.mrb[20].mxu0 %vm235_vm2, %v2867_v15 }
 0x518   :  { %3170 = vmatmul.mubr.msk.f32.gmra.mrb[18].mxu1 %vm235_vm2, %v2869_v16  ;;  %3177 = vmatprep.mubr.msk.f32.mxu0 %vm235_vm2, %v2880_v19 }
 0x519   :  { %3172 = vmatprep.mubr.msk.f32.mxu1 %vm3408_vm3, %v3407_v39 }
 0x51c   :  { %3173 = vmatmul.mubr.msk.f32.gmra.mrb[20].mxu1 %vm235_vm2, %v2870_v17 }
 0x51d   :  { %3185 = vmatprep.mubr.msk.f32.mxu1 %vm235_vm2, %v2884_v20 }
 0x5e2   :  { %v3677_v21 = vpop.f32.mrb[16].mxu0 }
 0x5e3   :  { %v3157_v22 = vpop.f32.mrb[17].mxu0 }
 0x5e4   :  { %v2900_v22 = vld [vmem:[%s4032_s5 + $0x60] sm:$0xff] }
 0x5e6   :  { %v3679_v23 = vpop.f32.mrb[18].mxu0 }
 0x5e7   :  { %v3160_v24 = vpop.f32.mrb[19].mxu0  ;;  %v3681_v25 = vpop.f32.mrb[16].mxu1 }
 0x5e8   :  { %v3168_v26 = vpop.f32.mrb[17].mxu1 }
 0x5ea   :  { %v1065_v28 = vpop.f32.mrb[20].mxu0 }
 0x5eb   :  { %v1066_v29 = vadd.f32 %v1065_v28, %v978_v27  ;;  %v3163_v30 = vpop.f32.mrb[21].mxu0  ;;  %v3683_v31 = vpop.f32.mrb[18].mxu1 }
 0x5ec   :  { %v3171_v33 = vpop.f32.mrb[19].mxu1  ;;  %v2902_v30 = vld [vmem:[%s4032_s5 + $0x70] sm:$0xff] }
 0x5ed   :  { %v1186_v34 = vadd.f32 %v1181_v32, %v1066_v29  ;;  %v2903_v29 = vld [vmem:[%s4032_s5 + $0x78] sm:$0xff]  ;;  %v2904_v32 = vld [vmem:[%s4032_s5 + $0x80] sm:$0xff]  ;;  %v2905_v33 = vld [vmem:[%s4032_s5 + $0x88] sm:$0xff] }
 0x5ef   :  { %3175 = vmatprep.subr.mxu0 %v1186_v34  ;;  %v1154_v36 = vpop.f32.mrb[20].mxu1 }
 0x5f0   :  { %v1155_v38 = vadd.f32 %v1154_v36, %v978_v27  ;;  %3176 = vmatpush3.msra.mxu0 %v1186_v34  ;;  %v3174_v40 = vpop.f32.mrb[21].mxu1  ;;  %v2901_v27 = vld [vmem:[%s4032_s5 + $0x68] sm:$0xff] }
 0x5f1   :  { %3178 = vmatmul.mubr.msk.f32.vlgmr.msra.gmra.mrb[22].mxu0 %vm235_vm2, %v2881_v35  ;;  %3191 = vmatprep.subr.mxu0 %v3407_v39  ;;  %v2919_v35 = vld [vmem:[%s4030_s3 + $0xe0] sm:$0xff] }
 0x5f2   :  { %v1187_v42 = vadd.f32 %v1183_v41, %v1155_v38  ;;  %3180 = vmatprep.mubr.msk.f32.mxu0 %vm235_vm2, %v2882_v37 }
 0x5f4   :  { %3183 = vmatprep.subr.mxu1 %v1187_v42 }
 0x5f5   :  { %3181 = vmatmul.mubr.msk.f32.gmra.mrb[24].mxu0 %vm235_vm2, %v2883_v43  ;;  %3184 = vmatpush3.msra.mxu1 %v1187_v42 }
 0x5f6   :  { %3186 = vmatmul.mubr.msk.f32.vlgmr.msra.gmra.mrb[22].mxu1 %vm235_vm2, %v2885_v44  ;;  %3193 = vmatprep.mubr.msk.f32.mxu0 %vm3408_vm3, %v3407_v39 }
 0x5f7   :  { %3188 = vmatprep.mubr.msk.f32.mxu1 %vm235_vm2, %v2886_v45  ;;  %3202 = vmatprep.subr.mxu1 %v3407_v39 }
 0x5fa   :  { %3189 = vmatmul.mubr.msk.f32.gmra.mrb[24].mxu1 %vm235_vm2, %v2887_v46 }
 0x5fb   :  { %3204 = vmatprep.mubr.msk.f32.mxu1 %vm3408_vm3, %v3407_v39 }
 0x6c4   :  { %v3179_v47 = vpop.f32.mrb[22].mxu0 }
 0x6c5   :  { %v1275_v48 = vpop.f32.mrb[23].mxu0 }
 0x6c8   :  { %v3182_v49 = vpop.f32.mrb[24].mxu0 }
 0x6c9   :  { %1397 = vrot.lane.b32.xlu0 %v3182_v49, %s3410_s19  ;;  %v1285_v50 = vpop.f32.mrb[25].mxu0  ;;  %v3187_v51 = vpop.f32.mrb[22].mxu1 }
 0x6ca   :  { %v1372_v52 = vpop.f32.mrb[23].mxu1 }
 0x6cd   :  { %1416 = vperm.xlu0 %3319, %v2896_v53   ;;  %v3190_v54 = vpop.f32.mrb[24].mxu1  ;;  %v2917_v53 = vld [vmem:[%s4030_s3 + $0xd0] sm:$0xff] }
 0x6ce   :  { %1401 = vrot.lane.b32.xlu1 %v3190_v54, %s3410_s19  ;;  %v1382_v55 = vpop.f32.mrb[25].mxu1 }
 0x6d1   :  { %1399 = vrot.lane.b32.xlu0 %v1382_v55, %s3410_s19 }
 0x6d2   :  { %1395 = vrot.lane.b32.xlu1 %v1285_v50, %s3410_s19 }
 0x6d5   :  { %1670 = vrot.lane.b32.xlu0 %v1186_v34, %s3410_s19  ;;  %v2915_v34 = vld [vmem:[%s4030_s3 + $0xc0] sm:$0xff] }
 0x6d6   :  { %1467 = vperm.xlu1 %3320, %v2908_v56  }
 0x6d9   :  { %1911 = vperm.xlu0 %3319, %v2932_v57  }
 0x6da   :  { %1672 = vrot.lane.b32.xlu1 %v1187_v42, %s3410_s19 }
 0x73b   :  { %v1398_v58 = vpop.permute.xlu0 %1397 }
 0x73c   :  { %v1408_v60 = vadd.f32 %v3179_v47, %v1398_v58  ;;  %v2918_v58 = vld [vmem:[%s4030_s3 + $0xd8] sm:$0xff] }
 0x73e   :  { %v1425_v61 = vadd.f32 %v1422_v59, %v1408_v60  ;;  %v2921_v60 = vld [vmem:[%s4030_s3 + $0xf0] sm:$0xff] }
 0x740   :  { %v2898_v62 = vmul.f32 -1.442695, %v1425_v61  ;;  %v1402_v63 = vpop.permute.xlu1 %1401  ;;  %v2922_v61 = vld [vmem:[%s4030_s3 + $0xf8] sm:$0xff] }
 0x741   :  { %v1410_v0 = vadd.f32 %v3187_v51, %v1402_v63  ;;  %v2916_v51 = vld [vmem:[%s4030_s3 + $0xc8] sm:$0xff] }
 0x742   :  { %3345 = vpow2.f32 %v2898_v62 }
 0x743   :  { %v1427_v1 = vadd.f32 %v1422_v59, %v1410_v0  ;;  %v2920_v59 = vld [vmem:[%s4030_s3 + $0xe8] sm:$0xff] }
 0x744   :  { %v1396_v3 = vpop.permute.xlu1 %1395 }
 0x745   :  { %v2899_v2 = vmul.f32 -1.442695, %v1427_v1  ;;  %v1407_v4 = vadd.f32 %v1396_v3, %v1275_v48 }
 0x747   :  { %3347 = vpow2.f32 %v2899_v2 }
 0x74c   :  { %v3346_v5 = vpop.eup %3345  ;;  %v1417_v6 = vpop.permute.xlu0 %1416 }
 0x74d   :  { %v1436_v7 = vadd.f32 1.0, %v3346_v5  ;;  %v1424_v8 = vadd.f32 %v1417_v6, %v1407_v4  ;;  %v2931_v4 = vld [vmem:[%s4031_s4 + $0x30] sm:$0xff] }
 0x74f   :  { %3349 = vrcp.f32 %v1436_v7  ;;  %v2943_v7 = vld [vmem:[%s4033_s6 + $0x58] sm:$0xff] }
 0x750   :  { %3351 = vtanh.f32 %v1424_v8  ;;  %v1400_v9 = vpop.permute.xlu0 %1399  ;;  %v2967_v8 = vld [vmem:[%s4031_s4 + $0x48] sm:$0xff] }
 0x751   :  { %v3348_v11 = vpop.eup %3347  ;;  %v1409_v14 = vadd.f32 %v1400_v9, %v1372_v52 }
 0x752   :  { %v1437_v15 = vadd.f32 1.0, %v3348_v11 }
 0x753   :  { %v1426_v16 = vadd.f32 %v1417_v6, %v1409_v14 }
 0x754   :  { %3353 = vrcp.f32 %v1437_v15  ;;  %v1671_v48 = vpop.permute.xlu0 %1670 }
 0x755   :  { %3355 = vtanh.f32 %v1426_v16  ;;  %v1468_v43 = vpop.permute.xlu1 %1467 }
 0x758   :  { %v1912_v11 = vpop.permute.xlu0 %1911 }
 0x759   :  { %v3350_v17 = vpop.eup %3349  ;;  %v1673_v56 = vpop.permute.xlu1 %1672 }
 0x75a   :  { %v3352_v19 = vpop.eup %3351 }
 0x75b   :  { %v1442_v20 = vmul.f32 %v3352_v19, %v3350_v17 }
 0x75d   :  { %3192 = vmatpush3.msra.mxu0 %v1442_v20 }
 0x75e   :  { %v3354_v24 = vpop.eup %3353  ;;  %3194 = vmatmul.mubr.msk.f32.vlgmr.msra.gmra.mrb[26].mxu0 %vm235_vm2, %v2900_v22 }
 0x75f   :  { %v3356_v26 = vpop.eup %3355  ;;  %3196 = vmatprep.mubr.msk.f32.mxu0 %vm3408_vm3, %v3407_v39 }
 0x760   :  { %v1443_v28 = vmul.f32 %v3356_v26, %v3354_v24 }
 0x762   :  { %3197 = vmatmul.mubr.msk.f32.gmra.mrb[28].mxu0 %vm235_vm2, %v2901_v27  ;;  %3203 = vmatpush3.msra.mxu1 %v1443_v28 }
 0x763   :  { %3205 = vmatmul.mubr.msk.f32.vlgmr.msra.gmra.mrb[26].mxu1 %vm235_vm2, %v2903_v29  ;;  %3199 = vmatprep.mubr.msk.f32.mxu0 %vm3408_vm3, %v3407_v39 }
 0x764   :  { %3207 = vmatprep.mubr.msk.f32.mxu1 %vm3408_vm3, %v3407_v39 }
 0x766   :  { %3200 = vmatmul.mubr.msk.f32.gmra.mrb[30].mxu0 %vm235_vm2, %v2902_v30 }
 0x767   :  { %3208 = vmatmul.mubr.msk.f32.gmra.mrb[28].mxu1 %vm235_vm2, %v2904_v32  ;;  %3215 = vmatprep.mubr.msk.f32.mxu0 %vm235_vm2, %v2915_v34 }
 0x768   :  { %3210 = vmatprep.mubr.msk.f32.mxu1 %vm3408_vm3, %v3407_v39 }
 0x76b   :  { %3211 = vmatmul.mubr.msk.f32.gmra.mrb[30].mxu1 %vm235_vm2, %v2905_v33 }
 0x76c   :  { %3223 = vmatprep.mubr.msk.f32.mxu1 %vm235_vm2, %v2919_v35 }
 0x831   :  { %v3770_v36 = vpop.f32.mrb[26].mxu0 }
 0x832   :  { %v3195_v37 = vpop.f32.mrb[27].mxu0 }
 0x835   :  { %v3772_v38 = vpop.f32.mrb[28].mxu0 }
 0x836   :  { %v3198_v40 = vpop.f32.mrb[29].mxu0  ;;  %v3774_v41 = vpop.f32.mrb[26].mxu1 }
 0x837   :  { %v3206_v42 = vpop.f32.mrb[27].mxu1 }
 0x839   :  { %v1555_v44 = vpop.f32.mrb[30].mxu0 }
 0x83a   :  { %v1556_v45 = vadd.f32 %v1555_v44, %v1468_v43  ;;  %v3201_v46 = vpop.f32.mrb[31].mxu0  ;;  %v3776_v47 = vpop.f32.mrb[28].mxu1  ;;  %v2935_v44 = vld [vmem:[%s4032_s5 + $0x90] sm:$0xff] }
 0x83b   :  { %v3209_v49 = vpop.f32.mrb[29].mxu1 }
 0x83c   :  { %v1676_v50 = vadd.f32 %v1671_v48, %v1556_v45  ;;  %v2936_v48 = vld [vmem:[%s4032_s5 + $0x98] sm:$0xff] }
 0x83e   :  { %3213 = vmatprep.subr.mxu0 %v1676_v50  ;;  %v1644_v52 = vpop.f32.mrb[30].mxu1 }
 0x83f   :  { %v1645_v54 = vadd.f32 %v1644_v52, %v1468_v43  ;;  %3214 = vmatpush3.msra.mxu0 %v1676_v50  ;;  %v3212_v55 = vpop.f32.mrb[31].mxu1  ;;  %v2939_v52 = vld [vmem:[%s4032_s5 + $0xb0] sm:$0xff] }
 0x840   :  { %3216 = vmatmul.mubr.msk.f32.vlgmr.msra.gmra.mrb[32].mxu0 %vm235_vm2, %v2916_v51  ;;  %3229 = vmatprep.subr.mxu0 %v3407_v39  ;;  %v2937_v51 = vld [vmem:[%s4032_s5 + $0xa0] sm:$0xff] }
 0x841   :  { %v1677_v57 = vadd.f32 %v1673_v56, %v1645_v54  ;;  %3218 = vmatprep.mubr.msk.f32.mxu0 %vm235_vm2, %v2917_v53  ;;  %v2940_v53 = vld [vmem:[%s4032_s5 + $0xb8] sm:$0xff]  ;;  %v2950_v54 = vld [vmem:[%s4030_s3 + $0x100] sm:$0xff] }
 0x842   :  { %v2954_v55 = vld [vmem:[%s4030_s3 + $0x120] sm:$0xff] }
 0x843   :  { %3221 = vmatprep.subr.mxu1 %v1677_v57 }
 0x844   :  { %3219 = vmatmul.mubr.msk.f32.gmra.mrb[34].mxu0 %vm235_vm2, %v2918_v58  ;;  %3222 = vmatpush3.msra.mxu1 %v1677_v57 }
 0x845   :  { %3224 = vmatmul.mubr.msk.f32.vlgmr.msra.gmra.mrb[32].mxu1 %vm235_vm2, %v2920_v59  ;;  %3231 = vmatprep.mubr.msk.f32.mxu0 %vm3408_vm3, %v3407_v39 }
 0x846   :  { %3226 = vmatprep.mubr.msk.f32.mxu1 %vm235_vm2, %v2921_v60  ;;  %3240 = vmatprep.subr.mxu1 %v3407_v39 }
 0x849   :  { %3227 = vmatmul.mubr.msk.f32.gmra.mrb[34].mxu1 %vm235_vm2, %v2922_v61 }
 0x84a   :  { %3242 = vmatprep.mubr.msk.f32.mxu1 %vm3408_vm3, %v3407_v39 }
 0x913   :  { %v3217_v62 = vpop.f32.mrb[32].mxu0 }
 0x914   :  { %v1765_v63 = vpop.f32.mrb[33].mxu0 }
 0x917   :  { %v3220_v0 = vpop.f32.mrb[34].mxu0 }
 0x918   :  { %1887 = vrot.lane.b32.xlu1 %v3220_v0, %s3406_s2  ;;  %v1775_v1 = vpop.f32.mrb[35].mxu0  ;;  %v3225_v2 = vpop.f32.mrb[32].mxu1 }
 0x919   :  { %v1862_v3 = vpop.f32.mrb[33].mxu1 }
 0x91c   :  { %1906 = vperm.xlu1 %3320, %v2931_v4   ;;  %v3228_v5 = vpop.f32.mrb[34].mxu1 }
 0x91d   :  { %1891 = vrot.lane.b32.xlu0 %v3228_v5, %s3406_s2  ;;  %v1872_v6 = vpop.f32.mrb[35].mxu1 }
 0x920   :  { %1889 = vrot.lane.b32.xlu1 %v1872_v6, %s3406_s2  ;;  %v2951_v6 = vld [vmem:[%s4030_s3 + $0x108] sm:$0xff] }
 0x921   :  { %1885 = vrot.lane.b32.xlu0 %v1775_v1, %s3406_s2 }
 0x924   :  { %2160 = vrot.lane.b32.xlu1 %v1676_v50, %s3406_s2  ;;  %v2938_v50 = vld [vmem:[%s4032_s5 + $0xa8] sm:$0xff] }
 0x925   :  { %1957 = vperm.xlu0 %3319, %v2943_v7  }
 0x928   :  { %2401 = vperm.xlu1 %3320, %v2967_v8   ;;  %v2952_v8 = vld [vmem:[%s4030_s3 + $0x110] sm:$0xff] }
 0x929   :  { %2162 = vrot.lane.b32.xlu0 %v1677_v57, %s3406_s2 }
 0x98a   :  { %v1888_v9 = vpop.permute.xlu1 %1887 }
 0x98b   :  { %v1898_v14 = vadd.f32 %v3217_v62, %v1888_v9 }
 0x98d   :  { %v1915_v15 = vadd.f32 %v1912_v11, %v1898_v14 }
 0x98f   :  { %v2933_v16 = vmul.f32 -1.442695, %v1915_v15  ;;  %v1892_v17 = vpop.permute.xlu0 %1891 }
 0x990   :  { %v1900_v19 = vadd.f32 %v3225_v2, %v1892_v17  ;;  %v2955_v17 = vld [vmem:[%s4030_s3 + $0x128] sm:$0xff] }
 0x991   :  { %3357 = vpow2.f32 %v2933_v16  ;;  %v2953_v16 = vld [vmem:[%s4030_s3 + $0x118] sm:$0xff] }
 0x992   :  { %v1917_v20 = vadd.f32 %v1912_v11, %v1900_v19  ;;  %v2956_v19 = vld [vmem:[%s4030_s3 + $0x130] sm:$0xff] }
 0x993   :  { %v1886_v24 = vpop.permute.xlu0 %1885 }
 0x994   :  { %v2934_v22 = vmul.f32 -1.442695, %v1917_v20  ;;  %v1897_v26 = vadd.f32 %v1886_v24, %v1765_v63  ;;  %v2957_v20 = vld [vmem:[%s4030_s3 + $0x138] sm:$0xff] }
 0x996   :  { %3359 = vpow2.f32 %v2934_v22 }
 0x99b   :  { %v3358_v27 = vpop.eup %3357  ;;  %v1907_v28 = vpop.permute.xlu1 %1906 }
 0x99c   :  { %v1926_v29 = vadd.f32 1.0, %v3358_v27  ;;  %v1914_v30 = vadd.f32 %v1907_v28, %v1897_v26 }
 0x99e   :  { %3361 = vrcp.f32 %v1926_v29 }
 0x99f   :  { %3363 = vtanh.f32 %v1914_v30  ;;  %v1890_v32 = vpop.permute.xlu1 %1889  ;;  %v488_v30 = vld [vmem:[%s4033_s6] sm:$0xff] }
 0x9a0   :  { %v3360_v33 = vpop.eup %3359  ;;  %v1899_v34 = vadd.f32 %v1890_v32, %v1862_v3 }
 0x9a1   :  { %v1927_v35 = vadd.f32 1.0, %v3360_v33 }
 0x9a2   :  { %v1916_v37 = vadd.f32 %v1907_v28, %v1899_v34  ;;  %v2966_v34 = vld [vmem:[%s4031_s4 + $0x40] sm:$0xff] }
 0x9a3   :  { %3365 = vrcp.f32 %v1927_v35  ;;  %v2161_v3 = vpop.permute.xlu1 %2160  ;;  %v489_v35 = vld [vmem:[%s4033_s6 + $0x8] sm:$0xff] }
 0x9a4   :  { %3367 = vtanh.f32 %v1916_v37  ;;  %v1958_v62 = vpop.permute.xlu0 %1957  ;;  %v2872_v37 = vld [vmem:[%s4033_s6 + $0x20] sm:$0xff] }
 0x9a8   :  { %v3362_v40 = vpop.eup %3361  ;;  %v2163_v14 = vpop.permute.xlu0 %2162 }
 0x9a9   :  { %v3364_v42 = vpop.eup %3363 }
 0x9aa   :  { %v1932_v43 = vmul.f32 %v3364_v42, %v3362_v40  ;;  %v2871_v40 = vld [vmem:[%s4033_s6 + $0x18] sm:$0xff] }
 0x9ac   :  { %3230 = vmatpush3.msra.mxu0 %v1932_v43  ;;  %v2402_v43 = vpop.permute.xlu1 %2401 }
 0x9ad   :  { %v3366_v45 = vpop.eup %3365  ;;  %3232 = vmatmul.mubr.msk.f32.vlgmr.msra.gmra.mrb[36].mxu0 %vm235_vm2, %v2935_v44 }
 0x9ae   :  { %v3368_v46 = vpop.eup %3367  ;;  %3234 = vmatprep.mubr.msk.f32.mxu0 %vm3408_vm3, %v3407_v39 }
 0x9af   :  { %v1933_v49 = vmul.f32 %v3368_v46, %v3366_v45 }
 0x9b1   :  { %3235 = vmatmul.mubr.msk.f32.gmra.mrb[38].mxu0 %vm235_vm2, %v2936_v48  ;;  %3241 = vmatpush3.msra.mxu1 %v1933_v49 }
 0x9b2   :  { %3243 = vmatmul.mubr.msk.f32.vlgmr.msra.gmra.mrb[36].mxu1 %vm235_vm2, %v2938_v50  ;;  %3237 = vmatprep.mubr.msk.f32.mxu0 %vm3408_vm3, %v3407_v39 }
 0x9b3   :  { %3245 = vmatprep.mubr.msk.f32.mxu1 %vm3408_vm3, %v3407_v39 }
 0x9b5   :  { %3238 = vmatmul.mubr.msk.f32.gmra.mrb[40].mxu0 %vm235_vm2, %v2937_v51 }
 0x9b6   :  { %3246 = vmatmul.mubr.msk.f32.gmra.mrb[38].mxu1 %vm235_vm2, %v2939_v52  ;;  %3253 = vmatprep.mubr.msk.f32.mxu0 %vm235_vm2, %v2950_v54 }
 0x9b7   :  { %3248 = vmatprep.mubr.msk.f32.mxu1 %vm3408_vm3, %v3407_v39 }
 0x9ba   :  { %3249 = vmatmul.mubr.msk.f32.gmra.mrb[40].mxu1 %vm235_vm2, %v2940_v53 }
 0x9bb   :  { %3261 = vmatprep.mubr.msk.f32.mxu1 %vm235_vm2, %v2954_v55 }
 0xa80   :  { %v3863_v56 = vpop.f32.mrb[36].mxu0 }
 0xa81   :  { %v3233_v57 = vpop.f32.mrb[37].mxu0 }
 0xa84   :  { %v3865_v58 = vpop.f32.mrb[38].mxu0 }
 0xa85   :  { %v3867_v59 = vpop.f32.mrb[36].mxu1  ;;  %v3236_v60 = vpop.f32.mrb[39].mxu0 }
 0xa86   :  { %v3244_v61 = vpop.f32.mrb[37].mxu1 }
 0xa88   :  { %v2045_v63 = vpop.f32.mrb[40].mxu0 }
 0xa89   :  { %v2046_v0 = vadd.f32 %v2045_v63, %v1958_v62  ;;  %v3869_v1 = vpop.f32.mrb[38].mxu1  ;;  %v3239_v2 = vpop.f32.mrb[41].mxu0 }
 0xa8a   :  { %v3247_v4 = vpop.f32.mrb[39].mxu1 }
 0xa8b   :  { %v2166_v5 = vadd.f32 %v2161_v3, %v2046_v0 }
 0xa8d   :  { %3251 = vmatprep.subr.mxu0 %v2166_v5  ;;  %v2134_v7 = vpop.f32.mrb[40].mxu1 }
 0xa8e   :  { %v2135_v9 = vadd.f32 %v2134_v7, %v1958_v62  ;;  %3252 = vmatpush3.msra.mxu0 %v2166_v5  ;;  %v3250_v11 = vpop.f32.mrb[41].mxu1  ;;  %v2907_v7 = vld [vmem:[%s4033_s6 + $0x38] sm:$0xff] }
 0xa8f   :  { %3254 = vmatmul.mubr.msk.f32.vlgmr.msra.gmra.mrb[42].mxu0 %vm235_vm2, %v2951_v6  ;;  %3267 = vmatprep.subr.mxu0 %v3407_v39 }
 0xa90   :  { %v2167_v15 = vadd.f32 %v2163_v14, %v2135_v9  ;;  %3256 = vmatprep.mubr.msk.f32.mxu0 %vm235_vm2, %v2952_v8 }
 0xa92   :  { %3259 = vmatprep.subr.mxu1 %v2167_v15 }
 0xa93   :  { %3257 = vmatmul.mubr.msk.f32.gmra.mrb[44].mxu0 %vm235_vm2, %v2953_v16  ;;  %3260 = vmatpush3.msra.mxu1 %v2167_v15  ;;  %v2973_v15 = vld [vmem:[%s4032_s5 + $0xd8] sm:$0xff] }
 0xa94   :  { %3262 = vmatmul.mubr.msk.f32.vlgmr.msra.gmra.mrb[42].mxu1 %vm235_vm2, %v2955_v17  ;;  %3278 = vmatprep.subr.mxu1 %v3407_v39  ;;  %v2970_v17 = vld [vmem:[%s4032_s5 + $0xc0] sm:$0xff] }
 0xa95   :  { %3264 = vmatprep.mubr.msk.f32.mxu1 %vm235_vm2, %v2956_v19  ;;  %3269 = vmatprep.mubr.msk.f32.mxu0 %vm3408_vm3, %v3407_v39  ;;  %v2974_v19 = vld [vmem:[%s4032_s5 + $0xe0] sm:$0xff] }
 0xa98   :  { %3265 = vmatmul.mubr.msk.f32.gmra.mrb[44].mxu1 %vm235_vm2, %v2957_v20  ;;  %v2971_v20 = vld [vmem:[%s4032_s5 + $0xc8] sm:$0xff] }
 0xa99   :  { %3280 = vmatprep.mubr.msk.f32.mxu1 %vm3408_vm3, %v3407_v39 }
 0xb62   :  { %v3255_v22 = vpop.f32.mrb[42].mxu0 }
 0xb63   :  { %v2255_v24 = vpop.f32.mrb[43].mxu0 }
 0xb66   :  { %v3258_v26 = vpop.f32.mrb[44].mxu0 }
 0xb67   :  { %2377 = vrot.lane.b32.xlu0 %v3258_v26, %s3409_s27  ;;  %v3263_v27 = vpop.f32.mrb[42].mxu1  ;;  %v2265_v28 = vpop.f32.mrb[45].mxu0 }
 0xb68   :  { %v2352_v29 = vpop.f32.mrb[43].mxu1 }
 0xb6b   :  { %493 = vperm.xlu0 %3319, %v488_v30   ;;  %v3266_v32 = vpop.f32.mrb[44].mxu1 }
 0xb6c   :  { %2381 = vrot.lane.b32.xlu1 %v3266_v32, %s3409_s27  ;;  %v2362_v33 = vpop.f32.mrb[45].mxu1 }
 0xb6f   :  { %2396 = vperm.xlu0 %3319, %v2966_v34  }
 0xb70   :  { %498 = vperm.xlu1 %3320, %v489_v35  }
 0xb73   :  { %2379 = vrot.lane.b32.xlu0 %v2362_v33, %s3409_s27 }
 0xb74   :  { %2375 = vrot.lane.b32.xlu1 %v2265_v28, %s3409_s27 }
 0xb77   :  { %972 = vperm.xlu0 %3319, %v2872_v37  }
 0xb78   :  { %967 = vperm.xlu1 %3320, %v2871_v40  }
 0xbd9   :  { %v2378_v42 = vpop.permute.xlu0 %2377 }
 0xbda   :  { %v2388_v44 = vadd.f32 %v3255_v22, %v2378_v42 }
 0xbdc   :  { %v2405_v45 = vadd.f32 %v2402_v43, %v2388_v44 }
 0xbde   :  { %v2382_v46 = vpop.permute.xlu1 %2381  ;;  %v2968_v49 = vmul.f32 -1.442695, %v2405_v45 }
 0xbdf   :  { %v2390_v48 = vadd.f32 %v3263_v27, %v2382_v46 }
 0xbe0   :  { %3369 = vpow2.f32 %v2968_v49 }
 0xbe1   :  { %v2407_v50 = vadd.f32 %v2402_v43, %v2390_v48 }
 0xbe3   :  { %v2969_v51 = vmul.f32 -1.442695, %v2407_v50 }
 0xbe5   :  { %3371 = vpow2.f32 %v2969_v51 }
 0xbea   :  { %v494_v52 = vpop.permute.xlu0 %493  ;;  %v3370_v54 = vpop.eup %3369 }
 0xbeb   :  { %v582_v53 = vadd.f32 %v3584_v10, %v494_v52  ;;  %v671_v60 = vadd.f32 %v3588_v13, %v494_v52  ;;  %v2416_v63 = vadd.f32 1.0, %v3370_v54  ;;  %v2906_v10 = vld [vmem:[%s4033_s6 + $0x30] sm:$0xff] }
 0xbed   :  { %1162 = vrot.lane.b32.xlu1 %v582_v53, %s3409_s27  ;;  %3373 = vrcp.f32 %v2416_v63  ;;  %v2977_v63 = vld [vmem:[%s4033_s6 + $0x68] sm:$0xff] }
 0xbee   :  { %v2397_v55 = vpop.permute.xlu0 %2396 }
 0xbef   :  { %v3372_v57 = vpop.eup %3371  ;;  %v499_v61 = vpop.permute.xlu1 %498 }
 0xbf0   :  { %v587_v62 = vadd.f32 %v3586_v12, %v499_v61  ;;  %v2417_v0 = vadd.f32 1.0, %v3372_v57  ;;  %v676_v5 = vadd.f32 %v3590_v18, %v499_v61 }
 0xbf1   :  { %1166 = vrot.lane.b32.xlu1 %v671_v60, %s3409_s27 }
 0xbf2   :  { %v2380_v2 = vpop.permute.xlu0 %2379  ;;  %1164 = vrot.lane.b32.xlu0 %v587_v62, %s3409_s27  ;;  %3375 = vrcp.f32 %v2417_v0 }
 0xbf3   :  { %v2389_v3 = vadd.f32 %v2380_v2, %v2352_v29  ;;  %v2376_v4 = vpop.permute.xlu1 %2375 }
 0xbf4   :  { %v2387_v6 = vadd.f32 %v2376_v4, %v2255_v24  ;;  %v2972_v4 = vld [vmem:[%s4032_s5 + $0xd0] sm:$0xff] }
 0xbf5   :  { %v2406_v13 = vadd.f32 %v2397_v55, %v2389_v3  ;;  %1457 = vperm.xlu1 %3320, %v2906_v10  }
 0xbf6   :  { %v2404_v12 = vadd.f32 %v2397_v55, %v2387_v6  ;;  %1168 = vrot.lane.b32.xlu0 %v676_v5, %s3409_s27  ;;  %v973_v27 = vpop.permute.xlu0 %972 }
 0xbf7   :  { %3377 = vtanh.f32 %v2406_v13  ;;  %v3374_v8 = vpop.eup %3373  ;;  %v968_v22 = vpop.permute.xlu1 %967  ;;  %v1061_v30 = vadd.f32 %v3679_v23, %v973_v27  ;;  %v1150_v37 = vadd.f32 %v3683_v31, %v973_v27  ;;  %v2942_v23 = vld [vmem:[%s4033_s6 + $0x50] sm:$0xff]  ;;  %v3411_v13 = vmov 0.0|0.0  }
 0xbf8   :  { %3379 = vtanh.f32 %v2404_v12  ;;  %v1056_v24 = vadd.f32 %v3677_v21, %v968_v22  ;;  %v1145_v29 = vadd.f32 %v3681_v25, %v968_v22  ;;  %v2941_v21 = vld [vmem:[%s4033_s6 + $0x48] sm:$0xff] }
 0xbfa   :  { %1462 = vperm.xlu0 %3319, %v2907_v7  }
 0xbfc   :  { %v3376_v9 = vpop.eup %3375 }
 0xc01   :  { %v3378_v11 = vpop.eup %3377 }
 0xc02   :  { %v3380_v14 = vpop.eup %3379  ;;  %v2423_v18 = vmul.f32 %v3378_v11, %v3376_v9 }
 0xc03   :  { %v2422_v16 = vmul.f32 %v3380_v14, %v3374_v8 }
 0xc04   :  { %3279 = vmatpush3.msra.mxu1 %v2423_v18  ;;  %v2651_v18 = vld [vmem:[%s4035_s8] sm:$0xf] }
 0xc05   :  { %3268 = vmatpush3.msra.mxu0 %v2422_v16  ;;  %3281 = vmatmul.mubr.msk.f32.vlgmr.msra.gmra.mrb[46].mxu1 %vm235_vm2, %v2973_v15 }
 0xc06   :  { %3270 = vmatmul.mubr.msk.f32.vlgmr.msra.gmra.mrb[46].mxu0 %vm235_vm2, %v2970_v17  ;;  %3283 = vmatprep.mubr.msk.f32.mxu1 %vm3408_vm3, %v3407_v39 }
 0xc07   :  { %3272 = vmatprep.mubr.msk.f32.mxu0 %vm3408_vm3, %v3407_v39  ;;  %3303 = vmatprep.subr.bf16.mxu0 %v3411_v13 }
 0xc08   :  { %3306 = vmatprep.subr.bf16.mxu1 %v3411_v13 }
 0xc09   :  { %3284 = vmatmul.mubr.msk.f32.gmra.mrb[48].mxu1 %vm235_vm2, %v2974_v19 }
 0xc0a   :  { %3273 = vmatmul.mubr.msk.f32.gmra.mrb[48].mxu0 %vm235_vm2, %v2971_v20  ;;  %3286 = vmatprep.mubr.msk.f32.mxu1 %vm3408_vm3, %v3407_v39 }
 0xc0b   :  { %3275 = vmatprep.mubr.msk.f32.mxu0 %vm3408_vm3, %v3407_v39 }
 0xc0e   :  { %3276 = vmatmul.mubr.msk.f32.gmra.mrb[50].mxu0 %vm235_vm2, %v2972_v4 }
 0xc0f   :  { %3293 = vmatprep.mubr.msk.f32.mxu0 %vm3408_vm3, %v3407_v39 }
 0xc5f   :  { %v1163_v26 = vpop.permute.xlu1 %1162 }
 0xc60   :  { %v1174_v28 = vadd.f32 %v1163_v26, %v1056_v24 }
 0xc62   :  { %1652 = vrot.lane.b32.xlu1 %v1174_v28, %s3410_s19 }
 0xc63   :  { %v1167_v32 = vpop.permute.xlu1 %1166 }
 0xc64   :  { %v1176_v33 = vadd.f32 %v1167_v32, %v1145_v29  ;;  %v1165_v34 = vpop.permute.xlu0 %1164 }
 0xc65   :  { %v1175_v35 = vadd.f32 %v1165_v34, %v1061_v30 }
 0xc66   :  { %1656 = vrot.lane.b32.xlu1 %v1176_v33, %s3410_s19 }
 0xc67   :  { %1654 = vrot.lane.b32.xlu0 %v1175_v35, %s3410_s19 }
 0xc68   :  { %v1169_v40 = vpop.permute.xlu0 %1168 }
 0xc69   :  { %v1177_v25 = vadd.f32 %v1169_v40, %v1150_v37  ;;  %v2645_v40 = vld [vmem:[%s4034_s7] sm:$0xf] }
 0xc6a   :  { %1947 = vperm.xlu1 %3320, %v2941_v21  }
 0xc6b   :  { %1658 = vrot.lane.b32.xlu0 %v1177_v25, %s3410_s19 }
 0xc6f   :  { %1952 = vperm.xlu0 %3319, %v2942_v23   ;;  %v2646_v23 = vld [vmem:[%s4034_s7 + $0x4] sm:$0xf] }
 0xc74   :  { %v1458_v42 = vpop.permute.xlu1 %1457 }
 0xc75   :  { %v1546_v43 = vadd.f32 %v3770_v36, %v1458_v42  ;;  %v1635_v46 = vadd.f32 %v3774_v41, %v1458_v42  ;;  %v2976_v41 = vld [vmem:[%s4033_s6 + $0x60] sm:$0xff] }
 0xc79   :  { %v1463_v44 = vpop.permute.xlu0 %1462 }
 0xc7a   :  { %v1551_v48 = vadd.f32 %v3772_v38, %v1463_v44  ;;  %v1640_v36 = vadd.f32 %v3776_v47, %v1463_v44 }
 0xcd4   :  { %v1653_v31 = vpop.permute.xlu1 %1652 }
 0xcd5   :  { %v1664_v45 = vadd.f32 %v1653_v31, %v1546_v43 }
 0xcd7   :  { %2142 = vrot.lane.b32.xlu1 %v1664_v45, %s3406_s2 }
 0xcd8   :  { %v1657_v49 = vpop.permute.xlu1 %1656  ;;  %v2612_v50 = vpop.f32.mrb[46].mxu1 }
 0xcd9   :  { %v1666_v51 = vadd.f32 %v1657_v49, %v1635_v46  ;;  %v1655_v52 = vpop.permute.xlu0 %1654  ;;  %v2524_v53 = vpop.f32.mrb[46].mxu0 }
 0xcda   :  { %v1665_v54 = vadd.f32 %v1655_v52, %v1551_v48  ;;  %v3271_v55 = vpop.f32.mrb[47].mxu0  ;;  %v3282_v57 = vpop.f32.mrb[47].mxu1 }
 0xcdb   :  { %2146 = vrot.lane.b32.xlu1 %v1666_v51, %s3406_s2 }
 0xcdc   :  { %2144 = vrot.lane.b32.xlu0 %v1665_v54, %s3406_s2  ;;  %v2617_v61 = vpop.f32.mrb[48].mxu1 }
 0xcdd   :  { %v1659_v60 = vpop.permute.xlu0 %1658  ;;  %v3285_v62 = vpop.f32.mrb[49].mxu1 }
 0xcde   :  { %v1667_v38 = vadd.f32 %v1659_v60, %v1640_v36  ;;  %v2529_v0 = vpop.f32.mrb[48].mxu0 }
 0xcdf   :  { %2437 = vperm.xlu1 %3320, %v2976_v41   ;;  %v3274_v47 = vpop.f32.mrb[49].mxu0 }
 0xce0   :  { %2148 = vrot.lane.b32.xlu0 %v1667_v38, %s3406_s2 }
 0xce1   :  { %v2534_v42 = vpop.f32.mrb[50].mxu0 }
 0xce2   :  { %v3277_v43 = vpop.f32.mrb[51].mxu0 }
 0xce4   :  { %2442 = vperm.xlu0 %3319, %v2977_v63  }
 0xce9   :  { %v1948_v2 = vpop.permute.xlu1 %1947 }
 0xcea   :  { %v2036_v10 = vadd.f32 %v3863_v56, %v1948_v2  ;;  %v2125_v12 = vadd.f32 %v3867_v59, %v1948_v2  ;;  %v2975_v56 = vld [vmem:[%s4032_s5 + $0xe8] sm:$0xff] }
 0xceb   :  { %3287 = vmatmul.mubr.msk.f32.gmra.mrb[50].mxu1 %vm235_vm2, %v2975_v56 }
 0xcec   :  { %3300 = vmatprep.mubr.msk.f32.mxu1 %vm3408_vm3, %v3407_v39 }
 0xcee   :  { %v1953_v5 = vpop.permute.xlu0 %1952 }
 0xcef   :  { %v2041_v7 = vadd.f32 %v3865_v58, %v1953_v5  ;;  %v2130_v59 = vadd.f32 %v3869_v1, %v1953_v5 }
 0xd49   :  { %v2143_v3 = vpop.permute.xlu1 %2142 }
 0xd4a   :  { %v2154_v6 = vadd.f32 %v2143_v3, %v2036_v10 }
 0xd4c   :  { %2629 = vrot.lane.b32.xlu1 %v2154_v6, %s3409_s27 }
 0xd4d   :  { %v2147_v8 = vpop.permute.xlu1 %2146 }
 0xd4e   :  { %v2156_v9 = vadd.f32 %v2147_v8, %v2125_v12  ;;  %v2145_v11 = vpop.permute.xlu0 %2144 }
 0xd4f   :  { %v2155_v14 = vadd.f32 %v2145_v11, %v2041_v7 }
 0xd50   :  { %2633 = vrot.lane.b32.xlu1 %v2156_v9, %s3409_s27 }
 0xd51   :  { %2631 = vrot.lane.b32.xlu0 %v2155_v14, %s3409_s27 }
 0xd52   :  { %v2149_v58 = vpop.permute.xlu0 %2148 }
 0xd53   :  { %v2157_v15 = vadd.f32 %v2149_v58, %v2130_v59 }
 0xd54   :  { %2654 = vperm.xlu1 %3320, %v2651_v18  }
 0xd55   :  { %2635 = vrot.lane.b32.xlu0 %v2157_v15, %s3409_s27 }
 0xd5e   :  { %v2438_v16 = vpop.permute.xlu1 %2437 }
 0xd5f   :  { %v2525_v39 = vadd.f32 %v2524_v53, %v2438_v16  ;;  %v2613_v1 = vadd.f32 %v2612_v50, %v2438_v16 }
 0xd63   :  { %v2443_v19 = vpop.permute.xlu0 %2442 }
 0xd64   :  { %v2530_v20 = vadd.f32 %v2529_v0, %v2443_v19  ;;  %v2618_v28 = vadd.f32 %v2617_v61, %v2443_v19 }
 0xdbe   :  { %v2630_v17 = vpop.permute.xlu1 %2629  ;;  %v2622_v31 = vpop.f32.mrb[50].mxu1 }
 0xdbf   :  { %v2641_v22 = vadd.f32 %v2630_v17, %v2525_v39  ;;  %v3288_v44 = vpop.f32.mrb[51].mxu1 }
 0xdc1   :  { %v2647_v29 = vmax.f32 %v2641_v22, 0.0 }
 0xdc2   :  { %v2634_v24 = vpop.permute.xlu1 %2633 }
 0xdc3   :  { %v2632_v26 = vpop.permute.xlu0 %2631  ;;  %v2643_v30 = vadd.f32 %v2634_v24, %v2613_v1 }
 0xdc4   :  { %v2642_v27 = vadd.f32 %v2632_v26, %v2530_v20 }
 0xdc5   :  { %v2649_v37 = vmax.f32 %v2643_v30, 0.0 }
 0xdc6   :  { %v2648_v32 = vmax.f32 %v2642_v27, 0.0 }
 0xdc7   :  { %v2636_v33 = vpop.permute.xlu0 %2635 }
 0xdc8   :  { %v3304_v34 = vpack.c.bf16 %v2648_v32, %v2647_v29  ;;  %v2644_v35 = vadd.f32 %v2636_v33, %v2618_v28 }
 0xdca   :  { %v2650_v21 = vmax.f32 %v2644_v35, 0.0  ;;  %3305 = vmatpush3.bf16.msra.mxu0 %v3304_v34 }
 0xdcc   :  { %v3307_v25 = vpack.c.bf16 %v2650_v21, %v2649_v37 }
 0xdcd   :  { %3294 = vmatmul.mubr.msk.f32.vlgmr.msra.gmra.mrb[52].mxu0 %vm2657_vm4, %v2645_v40 }
 0xdce   :  { %3308 = vmatpush3.bf16.msra.mxu1 %v3307_v25 }
 0xdd1   :  { %3301 = vmatmul.mubr.msk.f32.vlgmr.msra.gmra.mrb[52].mxu1 %vm2657_vm4, %v2646_v23 }
 0xdd3   :  { %v2655_v45 = vpop.permute.xlu1 %2654 }
 0xea0   :  { %v2727_v46 = vpop.f32.mrb[52].mxu0 }
 0xea1   :  { %v2728_v48 = vadd.f32 %v2727_v46, %v2655_v45  ;;  %v3295_v49 = vpop.f32.mrb[53].mxu0 }
 0xea3   :  { %2805 = vst.msk [vmem:[#allocation2] sm:$0xf] %vm2804_vm5, %v2728_v48 }
 0xea4   :  { %v2800_v50 = vpop.f32.mrb[52].mxu1 }
 0xea5   :  { %v2801_v51 = vadd.f32 %v2800_v50, %v2655_v45  ;;  %v3302_v52 = vpop.f32.mrb[53].mxu1 }
 0xea7   :  { %2806 = vst.msk [vmem:[#allocation2 + $0x4] sm:$0xf] %vm2804_vm5, %v2801_v51 }
 0xea8   :  { %3392 = shalt.err (!%p3389_p4)
}
 0xea9   :  { %s3393_s16 = scalar_lea.hbm %s4036_s9, 128 }
 0xeaa   :  { %p3394_p5 = scmp.ne.s32.totalorder %s4036_s9, %s3393_s16  ;;  %p3397_p6 = scmp.lt.u32.totalorder %s3393_s16, %s4036_s9 }
 0xeac   :  { %p3399_p7 = pnand %p3397_p6, %p3394_p5 }
 0xeae   :  { %3402 = shalt.err (!%p3399_p7)
}
 0xeaf   :  { %s3413_s21 = smov 64   ;;  %s3414_s22 = smov 4  }
 0xeb0   :  { %2818 = dma.vmem_to_hbm [thread:$0]  %s2813_s13, 128, %s4036_s9, [#allocation3], %s3413_s21, %s3413_s21, %s3414_s22  }
 0xeb1   :  { %3403 = dma.done.wait [#allocation3], 128  }
 0xeb2   :  { %3404 = vsyncadd [#allocation3], 4294967168 }
 0xeb3   :  { %2822 = vsyncpa [#allocation3], 1 }

</bundles_post_ra>
